<compile_context>
chip_gen: v5e
topology: v5e:2x2
jax: 0.10.0
libtpu: 0.0.40
codegen_flags: <defaults>
</compile_context>

<pallas_src>
import functools

import jax
import jax.numpy as jnp
import numpy as np
from jax.experimental import pallas as pl
from jax.experimental.pallas import tpu as pltpu

_ACTS = {
    "relu": lambda v: jnp.maximum(v, 0.0),
    "tanh": jnp.tanh,
}

_VMEM_SPEC = pl.BlockSpec(memory_space=pltpu.MemorySpace.VMEM)


# ----------------------------------------------------------------------------
# In-kernel building blocks (operate on values; layout = (channels, B*H*W))
# ----------------------------------------------------------------------------
def _conv_block(a, w_eff, bias, gmat, in_w, ksize):
    """Valid conv, stride 1.  a: (Cin, B*H*W) -> (Cout, B*OH*OW).

    `gmat` is a constant one-hot (L, B*OH*OW) spatial-gather matrix shared by
    all K*K taps; tap (i, j) is a static lane slice of `a` at offset i*in_w+j.
    `w_eff` is (Cout, K*K*Cin) with tap-major columns (k = (i*K+j)*Cin + ci).
    """
    L = gmat.shape[0]
    slices = [a[:, (i * in_w + j):(i * in_w + j) + L]
              for i in range(ksize) for j in range(ksize)]
    xs = jnp.concatenate(slices, axis=0)                              # (K*K*Cin, L)
    cols = jnp.dot(xs, gmat, preferred_element_type=jnp.float32)      # im2col^T
    return jnp.dot(w_eff, cols, preferred_element_type=jnp.float32) + bias


def _pool_block(a, pmat, in_w, pool_mode):
    """2x2 pool, stride 2.  a: (C, B*H*W) -> (C, B*(H//2)*(W//2))."""
    L = pmat.shape[0]
    taps = [jnp.dot(a[:, o:o + L], pmat, preferred_element_type=jnp.float32)
            for o in (0, 1, in_w, in_w + 1)]
    if pool_mode == "max":
        return jnp.maximum(jnp.maximum(taps[0], taps[1]),
                           jnp.maximum(taps[2], taps[3]))
    return (taps[0] + taps[1] + taps[2] + taps[3]) * 0.25


def _lenet4_kernel(x_ref, g1_ref, p1_ref, g2_ref, p2_ref, g3_ref,
                   w1_ref, b1_ref, w2_ref, b2_ref, w3_ref, b3_ref,
                   fc1w_ref, fc1b_ref, fc2w_ref, fc2b_ref, out_ref,
                   *, pool_mode, act_name):
    act = _ACTS[act_name]
    dot = functools.partial(jnp.dot, preferred_element_type=jnp.float32)

    # conv1 (1->4, 3x3, 14x14 -> 12x12) -> 2x2 pool -> act
    y = _conv_block(x_ref[...], w1_ref[...], b1_ref[...], g1_ref[...], 14, 3)
    y = act(_pool_block(y, p1_ref[...], 12, pool_mode))               # (4, B*36)

    # conv2 (4->16, 3x3, 6x6 -> 4x4) -> 2x2 pool -> act
    y = _conv_block(y, w2_ref[...], b2_ref[...], g2_ref[...], 6, 3)
    y = act(_pool_block(y, p2_ref[...], 4, pool_mode))                # (16, B*4)

    # conv3 (16->120, 2x2, 2x2 -> 1x1) -> act ; this IS the (120, B) flatten
    y = act(_conv_block(y, w3_ref[...], b3_ref[...], g3_ref[...], 2, 2))

    # drop1: identity (eval) -> fc1 -> act
    y = act(dot(fc1w_ref[...], y) + fc1b_ref[...])                    # (hidden, B)

    # drop2: identity (eval) -> fc2
    out_ref[...] = dot(fc2w_ref[...], y) + fc2b_ref[...]              # (10, B)


# ----------------------------------------------------------------------------
# Constant one-hot gather matrices (spatial bookkeeping, built once per B)
# ----------------------------------------------------------------------------
def _gather_matrix_np(B, H, W, OH, OW, stride):
    """One-hot (L, B*OH*OW): M[b*H*W + oh*stride*W + ow*stride, d] = 1."""
    D = B * OH * OW
    d = np.arange(D)
    b, r = np.divmod(d, OH * OW)
    oh, ow = np.divmod(r, OW)
    base = b * H * W + oh * stride * W + ow * stride
    m = np.zeros((int(base.max()) + 1, D), np.float32)
    m[base, d] = 1.0
    return m


@functools.lru_cache(maxsize=None)
def _gather_constants(B):
    return tuple(jnp.asarray(m) for m in (
        _gather_matrix_np(B, 14, 14, 12, 12, 1),   # conv1 taps
        _gather_matrix_np(B, 12, 12, 6, 6, 2),     # pool1 taps
        _gather_matrix_np(B, 6, 6, 4, 4, 1),       # conv2 taps
        _gather_matrix_np(B, 4, 4, 2, 2, 2),       # pool2 taps
        _gather_matrix_np(B, 2, 2, 1, 1, 1),       # conv3 taps
    ))


# ----------------------------------------------------------------------------
# Wrapper: single fused pallas_call
# ----------------------------------------------------------------------------
def lenet4_pallas(x, p, param):
    if param["activation"] not in _ACTS:
        raise ValueError("Activation must be 'relu' or 'tanh'")
    if param["pool"] not in ("max", "avg"):
        raise ValueError("Pool must be 'avg' or 'max'")
    B = x.shape[0]
    assert x.shape[1:] == (1, 14, 14), "LeNet4 plumbing assumes (B, 1, 14, 14)"
    g1, p1, g2, p2, g3 = _gather_constants(B)

    # Tap-major im2col weight layouts (tiny host-side reshapes; fuse under jit).
    w1 = p["conv1_w"].reshape(p["conv1_w"].shape[0], -1)                          # (4, 9)
    w2 = p["conv2_w"].transpose(0, 2, 3, 1).reshape(p["conv2_w"].shape[0], -1)    # (16, 36)
    w3 = p["conv3_w"].transpose(0, 2, 3, 1).reshape(p["conv3_w"].shape[0], -1)    # (120, 64)
    b1 = p["conv1_b"][:, None]
    b2 = p["conv2_b"][:, None]
    b3 = p["conv3_b"][:, None]
    fc1w, fc1b = p["fc1_w"], p["fc1_b"][:, None]
    fc2w, fc2b = p["fc2_w"], p["fc2_b"][:, None]
    x_flat = x.reshape(1, B * 14 * 14)                # (1, B*196): spatial in lanes

    args = (x_flat, g1, p1, g2, p2, g3, w1, b1, w2, b2, w3, b3,
            fc1w, fc1b, fc2w, fc2b)
    bytes_accessed = sum(int(np.prod(a.shape)) * 4 for a in args) + 10 * B * 4

    # NOTE: grid-less whole-array VMEM blocks are fine here (~1.5 MB total).
    # For large batches, tile B with a "parallel" grid axis (v7x: 2 TCs) and
    # cap block rows to respect v7x's 64 MiB/TC VMEM.
    out = pl.pallas_call(
        functools.partial(_lenet4_kernel, pool_mode=param["pool"],
                          act_name=param["activation"]),
        out_shape=jax.ShapeDtypeStruct((10, B), jnp.float32),
        in_specs=[_VMEM_SPEC] * len(args),
        out_specs=_VMEM_SPEC,
        cost_estimate=pl.CostEstimate(flops=1_600_000 * B,
                                      transcendentals=1_000 * B,
                                      bytes_accessed=bytes_accessed),
    )(*args)
    return out.T                                      # (B, 10) logits


# ----------------------------------------------------------------------------
# Independent plain-JAX reference (lax.conv / reduce_window)
# ----------------------------------------------------------------------------
def lenet4_reference(x, p, param):
    act = _ACTS[param["activation"]]
    hi = jax.lax.Precision.HIGHEST

    def conv(t, w, b):
        out = jax.lax.conv_general_dilated(
            t, w, window_strides=(1, 1), padding="VALID",
            dimension_numbers=("NCHW", "OIHW", "NCHW"), precision=hi)
        return out + b[None, :, None, None]

    def pool(t):
        if param["pool"] == "max":
            return jax.lax.reduce_window(t, -jnp.inf, jax.lax.max,
                                         (1, 1, 2, 2), (1, 1, 2, 2), "VALID")
        s = jax.lax.reduce_window(t, 0.0, jax.lax.add,
                                  (1, 1, 2, 2), (1, 1, 2, 2), "VALID")
        return s * 0.25

    y = act(pool(conv(x, p["conv1_w"], p["conv1_b"])))
    y = act(pool(conv(y, p["conv2_w"], p["conv2_b"])))
    y = act(conv(y, p["conv3_w"], p["conv3_b"])).reshape(x.shape[0], -1)   # (B, 120)
    y = act(jnp.dot(y, p["fc1_w"].T, precision=hi) + p["fc1_b"])
    return jnp.dot(y, p["fc2_w"].T, precision=hi) + p["fc2_b"]


# ----------------------------------------------------------------------------
# Deterministic parameter init (torch-like uniform(-1/sqrt(fan_in), +))
# ----------------------------------------------------------------------------
def init_params(key, hidden):
    def u(k, shape, fan_in):
        bound = 1.0 / np.sqrt(fan_in)
        return jax.random.uniform(k, shape, jnp.float32, -bound, bound)

    ks = jax.random.split(key, 10)
    return {
        "conv1_w": u(ks[0], (4, 1, 3, 3), 1 * 9),
        "conv1_b": u(ks[1], (4,), 1 * 9),
        "conv2_w": u(ks[2], (16, 4, 3, 3), 4 * 9),
        "conv2_b": u(ks[3], (16,), 4 * 9),
        "conv3_w": u(ks[4], (120, 16, 2, 2), 16 * 4),
        "conv3_b": u(ks[5], (120,), 16 * 4),
        "fc1_w": u(ks[6], (hidden, 120), 120),
        "fc1_b": u(ks[7], (hidden,), 120),
        "fc2_w": u(ks[8], (10, hidden), hidden),
        "fc2_b": u(ks[9], (10,), hidden),
    }


if __name__ == "__main__":
    param = {
        "hidden": 32,
        "drop_proba": [0.0, 0.0, 0.1, 0.1],
        "activation": "relu",
        "pool": "max",
    }
    root = jax.random.PRNGKey(0)
    pkey, xkey = jax.random.split(root)
    params = init_params(pkey, param["hidden"])

    # (B, C, H, W) = (2, 1, 14, 14): 14 -conv3x3-> 12 -pool-> 6 -conv3x3-> 4
    # -pool-> 2 -conv2x2-> 1  => x.view(-1, 120) is exactly (B, 120).
    x = jax.random.normal(xkey, (2, 1, 14, 14), jnp.float32)

    fwd = jax.jit(lambda inp, pp: lenet4_pallas(inp, pp, param))
    out = jax.block_until_ready(fwd(x, params))
    assert out.shape == (2, 10)

    ref = lenet4_reference(x, params, param)
    np.testing.assert_allclose(np.asarray(out), np.asarray(ref),
                               rtol=1e-4, atol=1e-4)

    print("KERNEL_OK")
</pallas_src>

<mosaic_0001>
module attributes {stable_mosaic.version = 11 : i64} {
  func.func @_lenet4_kernel(%arg0: memref<1x392xf32, #tpu.memory_space<vmem>>, %arg1: memref<362x288xf32, #tpu.memory_space<vmem>>, %arg2: memref<275x72xf32, #tpu.memory_space<vmem>>, %arg3: memref<58x32xf32, #tpu.memory_space<vmem>>, %arg4: memref<27x8xf32, #tpu.memory_space<vmem>>, %arg5: memref<5x2xf32, #tpu.memory_space<vmem>>, %arg6: memref<4x9xf32, #tpu.memory_space<vmem>>, %arg7: memref<4x1xf32, #tpu.memory_space<vmem>>, %arg8: memref<16x36xf32, #tpu.memory_space<vmem>>, %arg9: memref<16x1xf32, #tpu.memory_space<vmem>>, %arg10: memref<120x64xf32, #tpu.memory_space<vmem>>, %arg11: memref<120x1xf32, #tpu.memory_space<vmem>>, %arg12: memref<32x120xf32, #tpu.memory_space<vmem>>, %arg13: memref<32x1xf32, #tpu.memory_space<vmem>>, %arg14: memref<10x32xf32, #tpu.memory_space<vmem>>, %arg15: memref<10x1xf32, #tpu.memory_space<vmem>>, %arg16: memref<10x2xf32, #tpu.memory_space<vmem>>) attributes {dimension_semantics = [], scalar_prefetch = 0 : i64, scratch_operands = 0 : i64, tpu.core_type = #tpu.core_type<tc>} {
    %c0 = arith.constant 0 : index
    %c0_0 = arith.constant 0 : index
    %0 = vector.load %arg0[%c0, %c0_0] : memref<1x392xf32, #tpu.memory_space<vmem>>, vector<1x392xf32>
    %c0_1 = arith.constant 0 : index
    %c0_2 = arith.constant 0 : index
    %1 = vector.load %arg6[%c0_1, %c0_2] : memref<4x9xf32, #tpu.memory_space<vmem>>, vector<4x9xf32>
    %c0_3 = arith.constant 0 : index
    %c0_4 = arith.constant 0 : index
    %2 = vector.load %arg7[%c0_3, %c0_4] : memref<4x1xf32, #tpu.memory_space<vmem>>, vector<4x1xf32>
    %c0_5 = arith.constant 0 : index
    %c0_6 = arith.constant 0 : index
    %3 = vector.load %arg1[%c0_5, %c0_6] : memref<362x288xf32, #tpu.memory_space<vmem>>, vector<362x288xf32>
    %4 = vector.extract_strided_slice %0 {offsets = [0, 0], sizes = [1, 362], strides = [1, 1]} : vector<1x392xf32> to vector<1x362xf32>
    %5 = vector.extract_strided_slice %0 {offsets = [0, 1], sizes = [1, 362], strides = [1, 1]} : vector<1x392xf32> to vector<1x362xf32>
    %6 = vector.extract_strided_slice %0 {offsets = [0, 2], sizes = [1, 362], strides = [1, 1]} : vector<1x392xf32> to vector<1x362xf32>
    %7 = vector.extract_strided_slice %0 {offsets = [0, 14], sizes = [1, 362], strides = [1, 1]} : vector<1x392xf32> to vector<1x362xf32>
    %8 = vector.extract_strided_slice %0 {offsets = [0, 15], sizes = [1, 362], strides = [1, 1]} : vector<1x392xf32> to vector<1x362xf32>
    %9 = vector.extract_strided_slice %0 {offsets = [0, 16], sizes = [1, 362], strides = [1, 1]} : vector<1x392xf32> to vector<1x362xf32>
    %10 = vector.extract_strided_slice %0 {offsets = [0, 28], sizes = [1, 362], strides = [1, 1]} : vector<1x392xf32> to vector<1x362xf32>
    %11 = vector.extract_strided_slice %0 {offsets = [0, 29], sizes = [1, 362], strides = [1, 1]} : vector<1x392xf32> to vector<1x362xf32>
    %12 = vector.extract_strided_slice %0 {offsets = [0, 30], sizes = [1, 362], strides = [1, 1]} : vector<1x392xf32> to vector<1x362xf32>
    %13 = tpu.concatenate %4, %5, %6, %7, %8, %9, %10, %11, %12 in 0 : vector<1x362xf32>, vector<1x362xf32>, vector<1x362xf32>, vector<1x362xf32>, vector<1x362xf32>, vector<1x362xf32>, vector<1x362xf32>, vector<1x362xf32>, vector<1x362xf32> -> vector<9x362xf32>
    %cst = arith.constant dense<0.000000e+00> : vector<9x288xf32>
    %14 = tpu.matmul %13, %3, %cst {dimension_numbers = #tpu.dot_dimension_numbers<[1], [0], [0], [1], [0, 0, 1, 1], [], []>} : vector<9x362xf32>, vector<362x288xf32>, vector<9x288xf32> -> vector<9x288xf32>
    %cst_7 = arith.constant dense<0.000000e+00> : vector<4x288xf32>
    %15 = tpu.matmul %1, %14, %cst_7 {dimension_numbers = #tpu.dot_dimension_numbers<[1], [0], [0], [1], [0, 0, 1, 1], [], []>} : vector<4x9xf32>, vector<9x288xf32>, vector<4x288xf32> -> vector<4x288xf32>
    %16 = vector.broadcast %2 : vector<4x1xf32> to vector<4x288xf32>
    %17 = arith.addf %15, %16 : vector<4x288xf32>
    %c0_8 = arith.constant 0 : index
    %c0_9 = arith.constant 0 : index
    %18 = vector.load %arg2[%c0_8, %c0_9] : memref<275x72xf32, #tpu.memory_space<vmem>>, vector<275x72xf32>
    %19 = vector.extract_strided_slice %17 {offsets = [0, 0], sizes = [4, 275], strides = [1, 1]} : vector<4x288xf32> to vector<4x275xf32>
    %cst_10 = arith.constant dense<0.000000e+00> : vector<4x72xf32>
    %20 = tpu.matmul %19, %18, %cst_10 {dimension_numbers = #tpu.dot_dimension_numbers<[1], [0], [0], [1], [0, 0, 1, 1], [], []>} : vector<4x275xf32>, vector<275x72xf32>, vector<4x72xf32> -> vector<4x72xf32>
    %21 = vector.extract_strided_slice %17 {offsets = [0, 1], sizes = [4, 275], strides = [1, 1]} : vector<4x288xf32> to vector<4x275xf32>
    %cst_11 = arith.constant dense<0.000000e+00> : vector<4x72xf32>
    %22 = tpu.matmul %21, %18, %cst_11 {dimension_numbers = #tpu.dot_dimension_numbers<[1], [0], [0], [1], [0, 0, 1, 1], [], []>} : vector<4x275xf32>, vector<275x72xf32>, vector<4x72xf32> -> vector<4x72xf32>
    %23 = vector.extract_strided_slice %17 {offsets = [0, 12], sizes = [4, 275], strides = [1, 1]} : vector<4x288xf32> to vector<4x275xf32>
    %cst_12 = arith.constant dense<0.000000e+00> : vector<4x72xf32>
    %24 = tpu.matmul %23, %18, %cst_12 {dimension_numbers = #tpu.dot_dimension_numbers<[1], [0], [0], [1], [0, 0, 1, 1], [], []>} : vector<4x275xf32>, vector<275x72xf32>, vector<4x72xf32> -> vector<4x72xf32>
    %25 = vector.extract_strided_slice %17 {offsets = [0, 13], sizes = [4, 275], strides = [1, 1]} : vector<4x288xf32> to vector<4x275xf32>
    %cst_13 = arith.constant dense<0.000000e+00> : vector<4x72xf32>
    %26 = tpu.matmul %25, %18, %cst_13 {dimension_numbers = #tpu.dot_dimension_numbers<[1], [0], [0], [1], [0, 0, 1, 1], [], []>} : vector<4x275xf32>, vector<275x72xf32>, vector<4x72xf32> -> vector<4x72xf32>
    %27 = arith.maximumf %20, %22 : vector<4x72xf32>
    %28 = arith.maximumf %24, %26 : vector<4x72xf32>
    %29 = arith.maximumf %27, %28 : vector<4x72xf32>
    %cst_14 = arith.constant 0.000000e+00 : f32
    %30 = vector.broadcast %cst_14 : f32 to vector<4x72xf32>
    %31 = arith.maximumf %29, %30 : vector<4x72xf32>
    %c0_15 = arith.constant 0 : index
    %c0_16 = arith.constant 0 : index
    %32 = vector.load %arg8[%c0_15, %c0_16] : memref<16x36xf32, #tpu.memory_space<vmem>>, vector<16x36xf32>
    %c0_17 = arith.constant 0 : index
    %c0_18 = arith.constant 0 : index
    %33 = vector.load %arg9[%c0_17, %c0_18] : memref<16x1xf32, #tpu.memory_space<vmem>>, vector<16x1xf32>
    %c0_19 = arith.constant 0 : index
    %c0_20 = arith.constant 0 : index
    %34 = vector.load %arg3[%c0_19, %c0_20] : memref<58x32xf32, #tpu.memory_space<vmem>>, vector<58x32xf32>
    %35 = vector.extract_strided_slice %31 {offsets = [0, 0], sizes = [4, 58], strides = [1, 1]} : vector<4x72xf32> to vector<4x58xf32>
    %36 = vector.extract_strided_slice %31 {offsets = [0, 1], sizes = [4, 58], strides = [1, 1]} : vector<4x72xf32> to vector<4x58xf32>
    %37 = vector.extract_strided_slice %31 {offsets = [0, 2], sizes = [4, 58], strides = [1, 1]} : vector<4x72xf32> to vector<4x58xf32>
    %38 = vector.extract_strided_slice %31 {offsets = [0, 6], sizes = [4, 58], strides = [1, 1]} : vector<4x72xf32> to vector<4x58xf32>
    %39 = vector.extract_strided_slice %31 {offsets = [0, 7], sizes = [4, 58], strides = [1, 1]} : vector<4x72xf32> to vector<4x58xf32>
    %40 = vector.extract_strided_slice %31 {offsets = [0, 8], sizes = [4, 58], strides = [1, 1]} : vector<4x72xf32> to vector<4x58xf32>
    %41 = vector.extract_strided_slice %31 {offsets = [0, 12], sizes = [4, 58], strides = [1, 1]} : vector<4x72xf32> to vector<4x58xf32>
    %42 = vector.extract_strided_slice %31 {offsets = [0, 13], sizes = [4, 58], strides = [1, 1]} : vector<4x72xf32> to vector<4x58xf32>
    %43 = vector.extract_strided_slice %31 {offsets = [0, 14], sizes = [4, 58], strides = [1, 1]} : vector<4x72xf32> to vector<4x58xf32>
    %44 = tpu.concatenate %35, %36, %37, %38, %39, %40, %41, %42, %43 in 0 : vector<4x58xf32>, vector<4x58xf32>, vector<4x58xf32>, vector<4x58xf32>, vector<4x58xf32>, vector<4x58xf32>, vector<4x58xf32>, vector<4x58xf32>, vector<4x58xf32> -> vector<36x58xf32>
    %cst_21 = arith.constant dense<0.000000e+00> : vector<36x32xf32>
    %45 = tpu.matmul %44, %34, %cst_21 {dimension_numbers = #tpu.dot_dimension_numbers<[1], [0], [0], [1], [0, 0, 1, 1], [], []>} : vector<36x58xf32>, vector<58x32xf32>, vector<36x32xf32> -> vector<36x32xf32>
    %cst_22 = arith.constant dense<0.000000e+00> : vector<16x32xf32>
    %46 = tpu.matmul %32, %45, %cst_22 {dimension_numbers = #tpu.dot_dimension_numbers<[1], [0], [0], [1], [0, 0, 1, 1], [], []>} : vector<16x36xf32>, vector<36x32xf32>, vector<16x32xf32> -> vector<16x32xf32>
    %47 = vector.broadcast %33 : vector<16x1xf32> to vector<16x32xf32>
    %48 = arith.addf %46, %47 : vector<16x32xf32>
    %c0_23 = arith.constant 0 : index
    %c0_24 = arith.constant 0 : index
    %49 = vector.load %arg4[%c0_23, %c0_24] : memref<27x8xf32, #tpu.memory_space<vmem>>, vector<27x8xf32>
    %50 = vector.extract_strided_slice %48 {offsets = [0, 0], sizes = [16, 27], strides = [1, 1]} : vector<16x32xf32> to vector<16x27xf32>
    %cst_25 = arith.constant dense<0.000000e+00> : vector<16x8xf32>
    %51 = tpu.matmul %50, %49, %cst_25 {dimension_numbers = #tpu.dot_dimension_numbers<[1], [0], [0], [1], [0, 0, 1, 1], [], []>} : vector<16x27xf32>, vector<27x8xf32>, vector<16x8xf32> -> vector<16x8xf32>
    %52 = vector.extract_strided_slice %48 {offsets = [0, 1], sizes = [16, 27], strides = [1, 1]} : vector<16x32xf32> to vector<16x27xf32>
    %cst_26 = arith.constant dense<0.000000e+00> : vector<16x8xf32>
    %53 = tpu.matmul %52, %49, %cst_26 {dimension_numbers = #tpu.dot_dimension_numbers<[1], [0], [0], [1], [0, 0, 1, 1], [], []>} : vector<16x27xf32>, vector<27x8xf32>, vector<16x8xf32> -> vector<16x8xf32>
    %54 = vector.extract_strided_slice %48 {offsets = [0, 4], sizes = [16, 27], strides = [1, 1]} : vector<16x32xf32> to vector<16x27xf32>
    %cst_27 = arith.constant dense<0.000000e+00> : vector<16x8xf32>
    %55 = tpu.matmul %54, %49, %cst_27 {dimension_numbers = #tpu.dot_dimension_numbers<[1], [0], [0], [1], [0, 0, 1, 1], [], []>} : vector<16x27xf32>, vector<27x8xf32>, vector<16x8xf32> -> vector<16x8xf32>
    %56 = vector.extract_strided_slice %48 {offsets = [0, 5], sizes = [16, 27], strides = [1, 1]} : vector<16x32xf32> to vector<16x27xf32>
    %cst_28 = arith.constant dense<0.000000e+00> : vector<16x8xf32>
    %57 = tpu.matmul %56, %49, %cst_28 {dimension_numbers = #tpu.dot_dimension_numbers<[1], [0], [0], [1], [0, 0, 1, 1], [], []>} : vector<16x27xf32>, vector<27x8xf32>, vector<16x8xf32> -> vector<16x8xf32>
    %58 = arith.maximumf %51, %53 : vector<16x8xf32>
    %59 = arith.maximumf %55, %57 : vector<16x8xf32>
    %60 = arith.maximumf %58, %59 : vector<16x8xf32>
    %cst_29 = arith.constant 0.000000e+00 : f32
    %61 = vector.broadcast %cst_29 : f32 to vector<16x8xf32>
    %62 = arith.maximumf %60, %61 : vector<16x8xf32>
    %c0_30 = arith.constant 0 : index
    %c0_31 = arith.constant 0 : index
    %63 = vector.load %arg10[%c0_30, %c0_31] : memref<120x64xf32, #tpu.memory_space<vmem>>, vector<120x64xf32>
    %c0_32 = arith.constant 0 : index
    %c0_33 = arith.constant 0 : index
    %64 = vector.load %arg11[%c0_32, %c0_33] : memref<120x1xf32, #tpu.memory_space<vmem>>, vector<120x1xf32>
    %c0_34 = arith.constant 0 : index
    %c0_35 = arith.constant 0 : index
    %65 = vector.load %arg5[%c0_34, %c0_35] : memref<5x2xf32, #tpu.memory_space<vmem>>, vector<5x2xf32>
    %66 = vector.extract_strided_slice %62 {offsets = [0, 0], sizes = [16, 5], strides = [1, 1]} : vector<16x8xf32> to vector<16x5xf32>
    %67 = vector.extract_strided_slice %62 {offsets = [0, 1], sizes = [16, 5], strides = [1, 1]} : vector<16x8xf32> to vector<16x5xf32>
    %68 = vector.extract_strided_slice %62 {offsets = [0, 2], sizes = [16, 5], strides = [1, 1]} : vector<16x8xf32> to vector<16x5xf32>
    %69 = vector.extract_strided_slice %62 {offsets = [0, 3], sizes = [16, 5], strides = [1, 1]} : vector<16x8xf32> to vector<16x5xf32>
    %70 = tpu.concatenate %66, %67, %68, %69 in 0 : vector<16x5xf32>, vector<16x5xf32>, vector<16x5xf32>, vector<16x5xf32> -> vector<64x5xf32>
    %cst_36 = arith.constant dense<0.000000e+00> : vector<64x2xf32>
    %71 = tpu.matmul %70, %65, %cst_36 {dimension_numbers = #tpu.dot_dimension_numbers<[1], [0], [0], [1], [0, 0, 1, 1], [], []>} : vector<64x5xf32>, vector<5x2xf32>, vector<64x2xf32> -> vector<64x2xf32>
    %cst_37 = arith.constant dense<0.000000e+00> : vector<120x2xf32>
    %72 = tpu.matmul %63, %71, %cst_37 {dimension_numbers = #tpu.dot_dimension_numbers<[1], [0], [0], [1], [0, 0, 1, 1], [], []>} : vector<120x64xf32>, vector<64x2xf32>, vector<120x2xf32> -> vector<120x2xf32>
    %73 = vector.broadcast %64 : vector<120x1xf32> to vector<120x2xf32>
    %74 = arith.addf %72, %73 : vector<120x2xf32>
    %cst_38 = arith.constant 0.000000e+00 : f32
    %75 = vector.broadcast %cst_38 : f32 to vector<120x2xf32>
    %76 = arith.maximumf %74, %75 : vector<120x2xf32>
    %c0_39 = arith.constant 0 : index
    %c0_40 = arith.constant 0 : index
    %77 = vector.load %arg12[%c0_39, %c0_40] : memref<32x120xf32, #tpu.memory_space<vmem>>, vector<32x120xf32>
    %cst_41 = arith.constant dense<0.000000e+00> : vector<32x2xf32>
    %78 = tpu.matmul %77, %76, %cst_41 {dimension_numbers = #tpu.dot_dimension_numbers<[1], [0], [0], [1], [0, 0, 1, 1], [], []>} : vector<32x120xf32>, vector<120x2xf32>, vector<32x2xf32> -> vector<32x2xf32>
    %c0_42 = arith.constant 0 : index
    %c0_43 = arith.constant 0 : index
    %79 = vector.load %arg13[%c0_42, %c0_43] : memref<32x1xf32, #tpu.memory_space<vmem>>, vector<32x1xf32>
    %80 = vector.broadcast %79 : vector<32x1xf32> to vector<32x2xf32>
    %81 = arith.addf %78, %80 : vector<32x2xf32>
    %cst_44 = arith.constant 0.000000e+00 : f32
    %82 = vector.broadcast %cst_44 : f32 to vector<32x2xf32>
    %83 = arith.maximumf %81, %82 : vector<32x2xf32>
    %c0_45 = arith.constant 0 : index
    %c0_46 = arith.constant 0 : index
    %84 = vector.load %arg14[%c0_45, %c0_46] : memref<10x32xf32, #tpu.memory_space<vmem>>, vector<10x32xf32>
    %cst_47 = arith.constant dense<0.000000e+00> : vector<10x2xf32>
    %85 = tpu.matmul %84, %83, %cst_47 {dimension_numbers = #tpu.dot_dimension_numbers<[1], [0], [0], [1], [0, 0, 1, 1], [], []>} : vector<10x32xf32>, vector<32x2xf32>, vector<10x2xf32> -> vector<10x2xf32>
    %c0_48 = arith.constant 0 : index
    %c0_49 = arith.constant 0 : index
    %86 = vector.load %arg15[%c0_48, %c0_49] : memref<10x1xf32, #tpu.memory_space<vmem>>, vector<10x1xf32>
    %87 = vector.broadcast %86 : vector<10x1xf32> to vector<10x2xf32>
    %88 = arith.addf %85, %87 : vector<10x2xf32>
    %c0_50 = arith.constant 0 : index
    %c0_51 = arith.constant 0 : index
    %89 = vector.load %arg16[%c0_50, %c0_51] : memref<10x2xf32, #tpu.memory_space<vmem>>, vector<10x2xf32>
    tpu.vector_store %arg16[%c0_50, %c0_51], %88 {strides = array<i32>} : memref<10x2xf32, #tpu.memory_space<vmem>>, vector<10x2xf32>,
    return
  }
}

</mosaic_0001>

<bundles_post_ra>
// kernel: _lambda_.1
= control target key start
LH: loop header
LB: loop body
LE: loop exit
PB: predicated region body
PF: predicated region fallthrough
CT: control target
= control target key end

     0   :  { %s2662_s0 = inlined_call_operand.vmem [shape: f32[1,392], index: 0, kind: input, shape index: {}]   ;;  %s2663_s1 = inlined_call_operand.hbm [shape: f32[362,288], index: 1, kind: input, shape index: {}]   ;;  %s2664_s2 = inlined_call_operand.vmem [shape: f32[275,72], index: 2, kind: input, shape index: {}]   ;;  %s2665_s3 = inlined_call_operand.vmem [shape: f32[58,32], index: 3, kind: input, shape index: {}]   ;;  %s2666_s4 = inlined_call_operand.vmem [shape: f32[27,8], index: 4, kind: input, shape index: {}]   ;;  %s2667_s5 = inlined_call_operand.vmem [shape: f32[5,2], index: 5, kind: input, shape index: {}]   ;;  %s2668_s6 = inlined_call_operand.vmem [shape: f32[4,9], index: 6, kind: input, shape index: {}]   ;;  %s2669_s7 = inlined_call_operand.vmem [shape: f32[4,1], index: 7, kind: input, shape index: {}]   ;;  %s2670_s8 = inlined_call_operand.vmem [shape: f32[16,36], index: 8, kind: input, shape index: {}]   ;;  %s2671_s9 = inlined_call_operand.vmem [shape: f32[16,1], index: 9, kind: input, shape index: {}]   ;;  %s2672_s10 = inlined_call_operand.vmem [shape: f32[120,64], index: 10, kind: input, shape index: {}]   ;;  %s2673_s11 = inlined_call_operand.vmem [shape: f32[120,1], index: 11, kind: input, shape index: {}]   ;;  %s2674_s12 = inlined_call_operand.vmem [shape: f32[32,120], index: 12, kind: input, shape index: {}]   ;;  %s2675_s13 = inlined_call_operand.vmem [shape: f32[32,1], index: 13, kind: input, shape index: {}]   ;;  %s2676_s14 = inlined_call_operand.vmem [shape: f32[10,32], index: 14, kind: input, shape index: {}]   ;;  %s2677_s15 = inlined_call_operand.vmem [shape: f32[10,1], index: 15, kind: input, shape index: {}]   ;;  %s2678_s16 = inlined_call_operand.vmem [shape: f32[10,2], index: 16, kind: output, shape index: {}]  }
   0x1   :  { %2679 = sst [smem:[#allocation5_spill]] %s2662_s0 }
   0x2   :  { %21 = vsyncpa [#allocation3], 0  ;;  %s28_s23 = sshll.u32 %s2663_s1, 4  ;;  %s1865_s24 = smov [#allocation2]   ;;  %s29_s23 = int_to_ptr.hbm [resolvable:$true] %s28_s23 }
   0x3   :  { %s30_s25 = sshll.u32 %s1865_s24, 4  ;;  %s1866_s26 = smov 384   ;;  %s31_s25 = int_to_ptr.vmem [resolvable:$true] %s30_s25 }
   0x4   :  { %s1867_s27 = smov 24  }
   0x5   :  { %36 = dma.hbm_to_vmem [thread:$0]  %s29_s23, 17664, %s31_s25, [#allocation3], %s1866_s26, %s1866_s26, %s1867_s27  }
   0x6   :  { %1863 = dma.done.wait [#allocation3], 17664  }
   0x7   :  { %1864 = vsyncadd [#allocation3], 4294949632  ;;  %s2680_s30 = sld [smem:[#allocation5_spill]]  ;;  %s1868_s0 = smov 114   ;;  %v117_v6 = vld [vmem:[#allocation2 + $0x168] sm:$0xff]  ;;  %vm326_vm0 = vcmask 1041408  }
   0x8   :  { %s1869_s1 = smov 127   ;;  %s1870_s17 = smov 112   ;;  %v207_v7 = vld [vmem:[#allocation2 + $0x438] sm:$0x3]  ;;  %v114_v8 = vld [vmem:[#allocation2 + $0x150] sm:$0xff]  ;;  %365 = vmatpush.msra.mxu0 %v117_v6  ;;  %v204_v9 = vld [vmem:[#allocation2 + $0x420] sm:$0xff] }
   0x9   :  { %s1871_s18 = smov 113   ;;  %s1872_s19 = smov 126   ;;  %1679 = vmatpush.msk.msra.mxu2 %vm326_vm0, %v207_v7  ;;  %v111_v10 = vld [vmem:[#allocation2 + $0x138] sm:$0xff]  ;;  %v201_v11 = vld [vmem:[#allocation2 + $0x408] sm:$0xff]  ;;  %v108_v12 = vld [vmem:[#allocation2 + $0x120] sm:$0xff]  ;;  %vm322_vm1 = vcmask 1040384  }
   0xa   :  { %s1873_s20 = smov 100   ;;  %s1874_s21 = smov 99   ;;  %366 = vmatpush.msra.mxu0 %v114_v8  ;;  %v198_v13 = vld [vmem:[#allocation2 + $0x3f0] sm:$0xff]  ;;  %v165_v14 = vld [vmem:[#allocation2 + $0x2e8] sm:$0xff]  ;;  %v195_v17 = vld [vmem:[#allocation2 + $0x3d8] sm:$0xff]  ;;  %vm330_vm2 = vcmask 1042432  }
   0xb   :  { %s1875_s22 = smov 98   ;;  %414 = vmatpush.msra.mxu2 %v204_v9  ;;  %v118_v15 = vld [vmem:[#allocation2 + $0x170] sm:$0xff]  ;;  %v105_v16 = vld [vmem:[#allocation2 + $0x108] sm:$0xff]  ;;  %388 = vmatpush.msra.mxu1 %v165_v14  ;;  %v115_v19 = vld [vmem:[#allocation2 + $0x158] sm:$0xff]  ;;  %vm334_vm3 = vcmask 1043456   ;;  %vm301_vm4 = vcmask 809984  }
   0xc   :  { %367 = vmatpush.msra.mxu0 %v111_v10  ;;  %434 = vmatpush.msra.mxu3 %v118_v15  ;;  %v162_v18 = vld [vmem:[#allocation2 + $0x2d0] sm:$0xff]  ;;  %v192_v21 = vld [vmem:[#allocation2 + $0x3c0] sm:$0xff]  ;;  %v159_v22 = vld [vmem:[#allocation2 + $0x2b8] sm:$0xff]  ;;  %vm286_vm5 = vcmask 818176   ;;  %vm338_vm6 = vcmask 1044480   ;;  %vm342_vm7 = vcmask 1045504  }
   0xd   :  { %v1976_v0 = vld [vmem:[%s2680_s30] sm:$0xf]  ;;  %415 = vmatpush.msra.mxu2 %v201_v11  ;;  %389 = vmatpush.msra.mxu1 %v162_v18  ;;  %v102_v20 = vld [vmem:[#allocation2 + $0xf0] sm:$0xff]  ;;  %v99_v24 = vld [vmem:[#allocation2 + $0xd8] sm:$0xff]  ;;  %vm346_vm8 = vcmask 1046528   ;;  %vm350_vm9 = vcmask 867328  }
   0xe   :  { %v1979_v1 = vperm.slane %v1976_v0, 2  ;;  %v277_v2 = vperm.slane %v1976_v0, 3  ;;  %v211_v3 = vperm.slane %v1976_v0, 0  ;;  %v212_v4 = vperm.slane %v1976_v0, 1  ;;  %368 = vmatpush.msra.mxu0 %v108_v12  ;;  %435 = vmatpush.msra.mxu3 %v115_v19  ;;  %v112_v23 = vld [vmem:[#allocation2 + $0x140] sm:$0xff]  ;;  %v189_v25 = vld [vmem:[#allocation2 + $0x3a8] sm:$0xff] }
   0xf   :  { %416 = vmatpush.msra.mxu2 %v198_v13  ;;  %390 = vmatpush.msra.mxu1 %v159_v22  ;;  %v156_v26 = vld [vmem:[#allocation2 + $0x2a0] sm:$0xff]  ;;  %v109_v27 = vld [vmem:[#allocation2 + $0x128] sm:$0xff]  ;;  %v186_v29 = vld [vmem:[#allocation2 + $0x390] sm:$0xff]  ;;  %vm223_vm10 = vcmask 1039360   ;;  %vm235_vm11 = vcmask 1031168   ;;  %vm247_vm12 = vcmask 932864  }
  0x10   :  { %245 = vrot.lane.b32.xlu1 %v1979_v1, %s1868_s0  ;;  %221 = vrot.lane.b32.xlu0 %v1979_v1, %s1869_s1  ;;  %v1786_v5 = vpack.i.bf16 %v212_v4, %v211_v3  ;;  %v96_v28 = vld [vmem:[#allocation2 + $0xc0] sm:$0xff]  ;;  %v153_v30 = vld [vmem:[#allocation2 + $0x288] sm:$0xff]  ;;  %v106_v31 = vld [vmem:[#allocation2 + $0x110] sm:$0xff]  ;;  %vm259_vm13 = vcmask 924672   ;;  %vm271_vm14 = vcmask 916480   ;;  %vm316_vm15 = vcmask 801792  }
  0x11   :  { %269 = vrot.lane.b32.xlu2 %v1979_v1, %s1870_s17  ;;  %369 = vmatpush.msra.mxu0 %v105_v16  ;;  %v93_v32 = vld [vmem:[#allocation2 + $0xa8] sm:$0xff]  ;;  %v183_v33 = vld [vmem:[#allocation2 + $0x378] sm:$0xff]  ;;  %v150_v34 = vld [vmem:[#allocation2 + $0x270] sm:$0xff]  ;;  %s1879_s23 = smov 122   ;;  %s1880_s24 = smov 120  }
  0x12   :  { %417 = vmatpush.msra.mxu2 %v195_v17  ;;  %436 = vmatpush.msra.mxu3 %v112_v23  ;;  %v103_v35 = vld [vmem:[#allocation2 + $0xf8] sm:$0xff]  ;;  %v90_v36 = vld [vmem:[#allocation2 + $0x90] sm:$0xff]  ;;  %v180_v37 = vld [vmem:[#allocation2 + $0x360] sm:$0xff]  ;;  %s1881_s25 = smov 121  }
  0x13   :  { %370 = vmatpush.msra.mxu0 %v102_v20  ;;  %391 = vmatpush.msra.mxu1 %v156_v26  ;;  %v147_v38 = vld [vmem:[#allocation2 + $0x258] sm:$0xff]  ;;  %v100_v39 = vld [vmem:[#allocation2 + $0xe0] sm:$0xff]  ;;  %v177_v41 = vld [vmem:[#allocation2 + $0x348] sm:$0xff] }
  0x14   :  { %418 = vmatpush.msra.mxu2 %v192_v21  ;;  %437 = vmatpush.msra.mxu3 %v109_v27  ;;  %v87_v40 = vld [vmem:[#allocation2 + $0x78] sm:$0xff]  ;;  %v144_v42 = vld [vmem:[#allocation2 + $0x240] sm:$0xff]  ;;  %v97_v43 = vld [vmem:[#allocation2 + $0xc8] sm:$0xff] }
  0x15   :  { %371 = vmatpush.msra.mxu0 %v99_v24  ;;  %392 = vmatpush.msra.mxu1 %v153_v30  ;;  %v84_v44 = vld [vmem:[#allocation2 + $0x60] sm:$0xff]  ;;  %v174_v45 = vld [vmem:[#allocation2 + $0x330] sm:$0xff]  ;;  %v141_v46 = vld [vmem:[#allocation2 + $0x228] sm:$0xff] }
  0x16   :  { %419 = vmatpush.msra.mxu2 %v189_v25  ;;  %438 = vmatpush.msra.mxu3 %v106_v31  ;;  %v94_v47 = vld [vmem:[#allocation2 + $0xb0] sm:$0xff]  ;;  %v81_v48 = vld [vmem:[#allocation2 + $0x48] sm:$0xff]  ;;  %v171_v49 = vld [vmem:[#allocation2 + $0x318] sm:$0xff] }
  0x17   :  { %372 = vmatpush.msra.mxu0 %v96_v28  ;;  %393 = vmatpush.msra.mxu1 %v150_v34  ;;  %v138_v50 = vld [vmem:[#allocation2 + $0x210] sm:$0xff]  ;;  %v91_v51 = vld [vmem:[#allocation2 + $0x98] sm:$0xff]  ;;  %v168_v53 = vld [vmem:[#allocation2 + $0x300] sm:$0xff] }
  0x18   :  { %257 = vrot.lane.b32.xlu1 %v1979_v1, %s1871_s18  ;;  %233 = vrot.lane.b32.xlu0 %v1979_v1, %s1872_s19  ;;  %v78_v52 = vld [vmem:[#allocation2 + $0x30] sm:$0xff]  ;;  %v135_v54 = vld [vmem:[#allocation2 + $0x1f8] sm:$0xff]  ;;  %v88_v55 = vld [vmem:[#allocation2 + $0x80] sm:$0xff] }
  0x19   :  { %282 = vrot.lane.b32.xlu2 %v1979_v1, %s1873_s20  ;;  %420 = vmatpush.msra.mxu2 %v186_v29  ;;  %v166_v56 = vld [vmem:[#allocation2 + $0x2f0] sm:$0xff]  ;;  %v75_v57 = vld [vmem:[#allocation2 + $0x18] sm:$0xff]  ;;  %v132_v58 = vld [vmem:[#allocation2 + $0x1e0] sm:$0xff] }
  0x1a   :  { %373 = vmatpush.msra.mxu0 %v93_v32  ;;  %439 = vmatpush.msra.mxu3 %v103_v35  ;;  %v85_v59 = vld [vmem:[#allocation2 + $0x68] sm:$0xff]  ;;  %v163_v60 = vld [vmem:[#allocation2 + $0x2d8] sm:$0xff]  ;;  %v72_v62 = vld [vmem:[#allocation2] sm:$0xff] }
  0x1b   :  { %421 = vmatpush.msra.mxu2 %v183_v33  ;;  %394 = vmatpush.msra.mxu1 %v147_v38  ;;  %v129_v63 = vld [vmem:[#allocation2 + $0x1c8] sm:$0xff]  ;;  %v208_v6 = vld [vmem:[#allocation2 + $0x440] sm:$0x3]  ;;  %v126_v7 = vld [vmem:[#allocation2 + $0x1b0] sm:$0xff] }
  0x1c   :  { %374 = vmatpush.msra.mxu0 %v90_v36  ;;  %440 = vmatpush.msra.mxu3 %v100_v39  ;;  %v79_v8 = vld [vmem:[#allocation2 + $0x38] sm:$0xff]  ;;  %v157_v9 = vld [vmem:[#allocation2 + $0x2a8] sm:$0xff]  ;;  %v76_v12 = vld [vmem:[#allocation2 + $0x20] sm:$0xff] }
  0x1d   :  { %422 = vmatpush.msra.mxu2 %v180_v37  ;;  %395 = vmatpush.msra.mxu1 %v144_v42  ;;  %v205_v10 = vld [vmem:[#allocation2 + $0x428] sm:$0xff]  ;;  %v123_v11 = vld [vmem:[#allocation2 + $0x198] sm:$0xff]  ;;  %v154_v13 = vld [vmem:[#allocation2 + $0x290] sm:$0xff] }
  0x1e   :  { %375 = vmatpush.msra.mxu0 %v87_v40  ;;  %441 = vmatpush.msra.mxu3 %v97_v43  ;;  %v202_v14 = vld [vmem:[#allocation2 + $0x410] sm:$0xff]  ;;  %v120_v15 = vld [vmem:[#allocation2 + $0x180] sm:$0xff]  ;;  %v73_v16 = vld [vmem:[#allocation2 + $0x8] sm:$0xff] }
  0x1f   :  { %423 = vmatpush.msra.mxu2 %v177_v41  ;;  %396 = vmatpush.msra.mxu1 %v141_v46  ;;  %v151_v17 = vld [vmem:[#allocation2 + $0x278] sm:$0xff]  ;;  %v148_v21 = vld [vmem:[#allocation2 + $0x260] sm:$0xff]  ;;  %v145_v28 = vld [vmem:[#allocation2 + $0x248] sm:$0xff] }
  0x20   :  { %297 = vrot.lane.b32.xlu1 %v1979_v1, %s1874_s21  ;;  %284 = vrot.lane.b32.xlu0 %v277_v2, %s1873_s20  ;;  %v199_v18 = vld [vmem:[#allocation2 + $0x3f8] sm:$0xff]  ;;  %v196_v22 = vld [vmem:[#allocation2 + $0x3e0] sm:$0xff]  ;;  %v193_v29 = vld [vmem:[#allocation2 + $0x3c8] sm:$0xff] }
  0x21   :  { %299 = vrot.lane.b32.xlu2 %v277_v2, %s1874_s21  ;;  %376 = vmatpush.msra.mxu0 %v84_v44  ;;  %v119_v19 = vld [vmem:[#allocation2 + $0x178] sm:$0xff]  ;;  %v116_v23 = vld [vmem:[#allocation2 + $0x160] sm:$0xff]  ;;  %v113_v30 = vld [vmem:[#allocation2 + $0x148] sm:$0xff] }
  0x22   :  { %424 = vmatpush.msra.mxu2 %v174_v45  ;;  %442 = vmatpush.msra.mxu3 %v94_v47  ;;  %v167_v20 = vld [vmem:[#allocation2 + $0x2f8] sm:$0xff]  ;;  %v164_v25 = vld [vmem:[#allocation2 + $0x2e0] sm:$0xff]  ;;  %v161_v31 = vld [vmem:[#allocation2 + $0x2c8] sm:$0xff] }
  0x23   :  { %377 = vmatpush.msra.mxu0 %v81_v48  ;;  %397 = vmatpush.msra.mxu1 %v138_v50  ;;  %v142_v32 = vld [vmem:[#allocation2 + $0x230] sm:$0xff]  ;;  %v139_v36 = vld [vmem:[#allocation2 + $0x218] sm:$0xff]  ;;  %v136_v40 = vld [vmem:[#allocation2 + $0x200] sm:$0xff] }
  0x24   :  { %425 = vmatpush.msra.mxu2 %v171_v49  ;;  %443 = vmatpush.msra.mxu3 %v91_v51  ;;  %v190_v33 = vld [vmem:[#allocation2 + $0x3b0] sm:$0xff]  ;;  %v187_v37 = vld [vmem:[#allocation2 + $0x398] sm:$0xff]  ;;  %v184_v41 = vld [vmem:[#allocation2 + $0x380] sm:$0xff] }
  0x25   :  { %378 = vmatpush.msra.mxu0 %v78_v52  ;;  %398 = vmatpush.msra.mxu1 %v135_v54  ;;  %v110_v34 = vld [vmem:[#allocation2 + $0x130] sm:$0xff]  ;;  %v107_v38 = vld [vmem:[#allocation2 + $0x118] sm:$0xff]  ;;  %v104_v42 = vld [vmem:[#allocation2 + $0x100] sm:$0xff] }
  0x26   :  { %426 = vmatpush.msra.mxu2 %v168_v53  ;;  %444 = vmatpush.msra.mxu3 %v88_v55  ;;  %v158_v35 = vld [vmem:[#allocation2 + $0x2b0] sm:$0xff]  ;;  %v155_v39 = vld [vmem:[#allocation2 + $0x298] sm:$0xff]  ;;  %v152_v43 = vld [vmem:[#allocation2 + $0x280] sm:$0xff] }
  0x27   :  { %379 = vmatpush.msra.mxu0 %v75_v57  ;;  %399 = vmatpush.msra.mxu1 %v132_v58  ;;  %v133_v47 = vld [vmem:[#allocation2 + $0x1e8] sm:$0xff]  ;;  %v178_v53 = vld [vmem:[#allocation2 + $0x350] sm:$0xff]  ;;  %v127_v57 = vld [vmem:[#allocation2 + $0x1b8] sm:$0xff] }
  0x28   :  { %1787 = vrot.lane.b32.xlu1 %v1786_v5, %s1872_s19  ;;  %1782 = vrot.lane.b32.xlu0 %v1786_v5, %s1869_s1  ;;  %v181_v48 = vld [vmem:[#allocation2 + $0x368] sm:$0xff]  ;;  %v98_v54 = vld [vmem:[#allocation2 + $0xd0] sm:$0xff]  ;;  %v175_v58 = vld [vmem:[#allocation2 + $0x338] sm:$0xff] }
  0x29   :  { %1792 = vrot.lane.b32.xlu2 %v1786_v5, %s1868_s0  ;;  %457 = vmatpush.msrb.mxu2 %v166_v56  ;;  %v101_v50 = vld [vmem:[#allocation2 + $0xe8] sm:$0xff]  ;;  %v146_v56 = vld [vmem:[#allocation2 + $0x250] sm:$0xff] }
  0x2a   :  { %445 = vmatpush.msra.mxu3 %v85_v59  ;;  %380 = vmatpush.msra.mxu0 %v72_v62  ;;  %v149_v51 = vld [vmem:[#allocation2 + $0x268] sm:$0xff]  ;;  %v143_v62 = vld [vmem:[#allocation2 + $0x238] sm:$0xff] }
  0x2b   :  { %458 = vmatpush.msrb.mxu2 %v163_v60  ;;  %400 = vmatpush.msra.mxu1 %v129_v63  ;;  %v95_v60 = vld [vmem:[#allocation2 + $0xb8] sm:$0xff]  ;;  %v124_v63 = vld [vmem:[#allocation2 + $0x1a0] sm:$0xff] }
  0x2c   :  { %1682 = vmatpush.msk.msrb.mxu0 %vm326_vm0, %v208_v6  ;;  %v140_v6 = vld [vmem:[#allocation2 + $0x220] sm:$0xff] }
  0x2d   :  { %401 = vmatpush.msra.mxu1 %v126_v7 }
  0x2e   :  { %483 = vmatpush.msrb.mxu0 %v205_v10  ;;  %v169_v10 = vld [vmem:[#allocation2 + $0x308] sm:$0xff] }
  0x2f   :  { %402 = vmatpush.msra.mxu1 %v123_v11 }
  0x30   :  { %1802 = vrot.lane.b32.xlu1 %v1786_v5, %s1870_s17  ;;  %1797 = vrot.lane.b32.xlu0 %v1786_v5, %s1871_s18 }
  0x31   :  { %1807 = vrot.lane.b32.xlu2 %v1786_v5, %s1873_s20  ;;  %484 = vmatpush.msrb.mxu0 %v202_v14 }
  0x32   :  { %403 = vmatpush.msra.mxu1 %v120_v15  ;;  %v89_v15 = vld [vmem:[#allocation2 + $0x88] sm:$0xff] }
  0x33   :  { %485 = vmatpush.msrb.mxu0 %v199_v18  ;;  %v86_v18 = vld [vmem:[#allocation2 + $0x70] sm:$0xff] }
  0x34   :  { %503 = vmatpush.msrb.mxu1 %v119_v19  ;;  %v134_v19 = vld [vmem:[#allocation2 + $0x1f0] sm:$0xff] }
  0x35   :  { %486 = vmatpush.msrb.mxu0 %v196_v22  ;;  %v131_v22 = vld [vmem:[#allocation2 + $0x1d8] sm:$0xff] }
  0x36   :  { %504 = vmatpush.msrb.mxu1 %v116_v23  ;;  %v80_v23 = vld [vmem:[#allocation2 + $0x40] sm:$0xff] }
  0x37   :  { %487 = vmatpush.msrb.mxu0 %v193_v29 }
  0x38   :  { %312 = vrot.lane.b32.xlu1 %v1979_v1, %s1875_s22  ;;  %1812 = vrot.lane.b32.xlu0 %v1786_v5, %s1874_s21 }
  0x39   :  { %314 = vrot.lane.b32.xlu2 %v277_v2, %s1875_s22  ;;  %v82_v2 = vld [vmem:[#allocation2 + $0x50] sm:$0xff]  ;;  %505 = vmatpush.msrb.mxu1 %v113_v30 }
  0x3a   :  { %446 = vmatpush.msra.mxu3 %v82_v2  ;;  %488 = vmatpush.msrb.mxu0 %v190_v33  ;;  %v172_v2 = vld [vmem:[#allocation2 + $0x320] sm:$0xff] }
  0x3b   :  { %506 = vmatpush.msrb.mxu1 %v110_v34  ;;  %v77_v34 = vld [vmem:[#allocation2 + $0x28] sm:$0xff] }
  0x3c   :  { %447 = vmatpush.msra.mxu3 %v79_v8  ;;  %489 = vmatpush.msrb.mxu0 %v187_v37 }
  0x3d   :  { %507 = vmatpush.msrb.mxu1 %v107_v38  ;;  %v74_v38 = vld [vmem:[#allocation2 + $0x10] sm:$0xff] }
  0x3e   :  { %448 = vmatpush.msra.mxu3 %v76_v12  ;;  %490 = vmatpush.msrb.mxu0 %v184_v41 }
  0x3f   :  { %508 = vmatpush.msrb.mxu1 %v104_v42 }
  0x40   :  { %1817 = vrot.lane.b32.xlu0 %v1786_v5, %s1875_s22  ;;  %v160_v5 = vld [vmem:[#allocation2 + $0x2c0] sm:$0xff]  ;;  %449 = vmatpush.msra.mxu3 %v73_v16  ;;  %v137_v16 = vld [vmem:[#allocation2 + $0x208] sm:$0xff]  ;;  %s1878_s22 = smov 115  }
  0x41   :  { %459 = vmatpush.msrb.mxu2 %v160_v5  ;;  %491 = vmatpush.msrb.mxu0 %v181_v48  ;;  %v92_v5 = vld [vmem:[#allocation2 + $0xa0] sm:$0xff] }
  0x42   :  { %526 = vmatpush.msrb.mxu3 %v167_v20  ;;  %509 = vmatpush.msrb.mxu1 %v101_v50 }
  0x43   :  { %460 = vmatpush.msrb.mxu2 %v157_v9  ;;  %492 = vmatpush.msrb.mxu0 %v178_v53  ;;  %v121_v9 = vld [vmem:[#allocation2 + $0x188] sm:$0xff] }
  0x44   :  { %527 = vmatpush.msrb.mxu3 %v164_v25  ;;  %510 = vmatpush.msrb.mxu1 %v98_v54  ;;  %v128_v25 = vld [vmem:[#allocation2 + $0x1c0] sm:$0xff] }
  0x45   :  { %461 = vmatpush.msrb.mxu2 %v154_v13  ;;  %493 = vmatpush.msrb.mxu0 %v175_v58 }
  0x46   :  { %528 = vmatpush.msrb.mxu3 %v161_v31  ;;  %511 = vmatpush.msrb.mxu1 %v95_v60 }
  0x47   :  { %462 = vmatpush.msrb.mxu2 %v151_v17  ;;  %494 = vmatpush.msrb.mxu0 %v172_v2 }
  0x48   :  { %529 = vmatpush.msrb.mxu3 %v158_v35  ;;  %512 = vmatpush.msrb.mxu1 %v92_v5  ;;  %v125_v35 = vld [vmem:[#allocation2 + $0x1a8] sm:$0xff] }
  0x49   :  { %463 = vmatpush.msrb.mxu2 %v148_v21  ;;  %495 = vmatpush.msrb.mxu0 %v169_v10  ;;  %v83_v21 = vld [vmem:[#allocation2 + $0x58] sm:$0xff] }
  0x4a   :  { %530 = vmatpush.msrb.mxu3 %v155_v39  ;;  %513 = vmatpush.msrb.mxu1 %v89_v15  ;;  %v122_v39 = vld [vmem:[#allocation2 + $0x190] sm:$0xff] }
  0x4b   :  { %464 = vmatpush.msrb.mxu2 %v145_v28 }
  0x4c   :  { %531 = vmatpush.msrb.mxu3 %v152_v43  ;;  %514 = vmatpush.msrb.mxu1 %v86_v18 }
  0x4d   :  { %465 = vmatpush.msrb.mxu2 %v142_v32 }
  0x4e   :  { %532 = vmatpush.msrb.mxu3 %v149_v51  ;;  %515 = vmatpush.msrb.mxu1 %v83_v21 }
  0x4f   :  { %466 = vmatpush.msrb.mxu2 %v139_v36 }
  0x50   :  { %533 = vmatpush.msrb.mxu3 %v146_v56  ;;  %516 = vmatpush.msrb.mxu1 %v80_v23 }
  0x51   :  { %467 = vmatpush.msrb.mxu2 %v136_v40 }
  0x52   :  { %534 = vmatpush.msrb.mxu3 %v143_v62  ;;  %517 = vmatpush.msrb.mxu1 %v77_v34  ;;  %v182_v34 = vld [vmem:[#allocation2 + $0x370] sm:$0xff] }
  0x53   :  { %468 = vmatpush.msrb.mxu2 %v133_v47 }
  0x54   :  { %535 = vmatpush.msrb.mxu3 %v140_v6  ;;  %518 = vmatpush.msrb.mxu1 %v74_v38  ;;  %v170_v38 = vld [vmem:[#allocation2 + $0x310] sm:$0xff] }
  0x56   :  { %536 = vmatpush.msrb.mxu3 %v137_v16  ;;  %v209_v16 = vld [vmem:[#allocation2 + $0x448] sm:$0x3] }
  0x58   :  { %537 = vmatpush.msrb.mxu3 %v134_v19 }
  0x5a   :  { %538 = vmatpush.msrb.mxu3 %v131_v22 }
  0x5c   :  { %539 = vmatpush.msrb.mxu3 %v128_v25  ;;  %v200_v25 = vld [vmem:[#allocation2 + $0x400] sm:$0xff] }
  0x5e   :  { %540 = vmatpush.msrb.mxu3 %v125_v35  ;;  %v179_v35 = vld [vmem:[#allocation2 + $0x358] sm:$0xff] }
  0x60   :  { %541 = vmatpush.msrb.mxu3 %v122_v39 }
  0x6b   :  { %v2003_v61 = vpop.permute.xlu2 %269 }
  0x73   :  { %v2006_v24 = vpop.permute.xlu2 %282 }
  0x7b   :  { %v300_v52 = vpop.permute.xlu2 %299 }
  0x82   :  { %v2008_v26 = vpop.permute.xlu1 %245  ;;  %v2010_v27 = vpop.permute.xlu0 %221 }
  0x83   :  { %v325_v44 = vsel %vm322_vm1, %v1979_v1, %v2010_v27  ;;  %v130_v1 = vld [vmem:[#allocation2 + $0x1d0] sm:$0xff]  ;;  %v1793_v20 = vpop.permute.xlu2 %1792 }
  0x84   :  { %469 = vmatpush.msrb.mxu2 %v130_v1  ;;  %v1794_v40 = vunpack.i.l.bf16 %v1793_v20 }
  0x86   :  { %470 = vmatpush.msrb.mxu2 %v127_v57 }
  0x88   :  { %471 = vmatpush.msrb.mxu2 %v124_v63 }
  0x8a   :  { %v2015_v45 = vpop.permute.xlu1 %257  ;;  %v2017_v46 = vpop.permute.xlu0 %233  ;;  %472 = vmatpush.msrb.mxu2 %v121_v9 }
  0x8b   :  { %v329_v49 = vsel %vm326_vm0, %v325_v44, %v2017_v46  ;;  %v1808_v47 = vpop.permute.xlu2 %1807 }
  0x8c   :  { %v333_v55 = vsel %vm330_vm2, %v329_v49, %v2008_v26  ;;  %v1810_v63 = vunpack.i.h.bf16 %v1808_v47 }
  0x8d   :  { %v337_v59 = vsel %vm334_vm3, %v333_v55, %v2015_v45  ;;  %v1809_v55 = vunpack.i.l.bf16 %v1808_v47 }
  0x8e   :  { %v341_v13 = vsel %vm338_vm6, %v337_v59, %v2003_v61 }
  0x92   :  { %v2025_v7 = vpop.permute.xlu1 %297  ;;  %v285_v8 = vpop.permute.xlu0 %284 }
  0x93   :  { %v304_v11 = vsel %vm301_vm4, %v2025_v7, %v300_v52  ;;  %v289_v12 = vsel %vm286_vm5, %v2006_v24, %v285_v8  ;;  %v315_v2 = vpop.permute.xlu2 %314 }
  0x94   :  { %v345_v14 = vsel %vm342_vm7, %v341_v13, %v289_v12 }
  0x95   :  { %v2035_v17 = vsel %vm346_vm8, %v345_v14, %v304_v11  ;;  %v288_v11 = vsel %vm286_vm5, %v1810_v63, %v2006_v24  ;;  %v203_v24 = vld [vmem:[#allocation2 + $0x418] sm:$0xff] }
  0x96   :  { %1680 = vmatmul.msk.f32.vlgmr.msra.gmra.mxu2 %vm350_vm9, %v2035_v17 }
  0x9a   :  { %v1788_v28 = vpop.permute.xlu1 %1787  ;;  %v1783_v29 = vpop.permute.xlu0 %1782 }
  0x9b   :  { %v1790_v30 = vunpack.i.h.bf16 %v1788_v28  ;;  %v1789_v31 = vunpack.i.l.bf16 %v1788_v28  ;;  %v1785_v32 = vunpack.i.h.bf16 %v1783_v29  ;;  %v1784_v33 = vunpack.i.l.bf16 %v1783_v29  ;;  %v197_v29 = vld [vmem:[#allocation2 + $0x3e8] sm:$0xff] }
  0x9d   :  { %v225_v36 = vsel %vm223_vm10, %v1785_v32, %v2010_v27  ;;  %v224_v37 = vsel %vm223_vm10, %v1784_v33, %v1785_v32  ;;  %v237_v41 = vsel %vm235_vm11, %v1790_v30, %v2017_v46  ;;  %v236_v42 = vsel %vm235_vm11, %v1789_v31, %v1790_v30  ;;  %v194_v30 = vld [vmem:[#allocation2 + $0x3d0] sm:$0xff]  ;;  %v191_v31 = vld [vmem:[#allocation2 + $0x3b8] sm:$0xff]  ;;  %v188_v32 = vld [vmem:[#allocation2 + $0x3a0] sm:$0xff] }
  0x9e   :  { %v324_v43 = vsel %vm322_vm1, %v212_v4, %v225_v36  ;;  %v323_v44 = vsel %vm322_vm1, %v211_v3, %v224_v37  ;;  %v1795_v27 = vunpack.i.h.bf16 %v1793_v20  ;;  %v206_v20 = vld [vmem:[#allocation2 + $0x430] sm:$0xff]  ;;  %v185_v33 = vld [vmem:[#allocation2 + $0x388] sm:$0xff]  ;;  %v176_v36 = vld [vmem:[#allocation2 + $0x340] sm:$0xff]  ;;  %vm1670_vm11 = vcmask 15360  }
  0x9f   :  { %v328_v49 = vsel %vm326_vm0, %v324_v43, %v237_v41  ;;  %v327_v50 = vsel %vm326_vm0, %v323_v44, %v236_v42  ;;  %v173_v37 = vld [vmem:[#allocation2 + $0x328] sm:$0xff] }
  0xa0   :  { %v248_v48 = vsel %vm247_vm12, %v1794_v40, %v1795_v27  ;;  %v249_v0 = vsel %vm247_vm12, %v1795_v27, %v2008_v26  ;;  %vm1672_vm12 = vcmask 9216  }
  0xa1   :  { %v331_v56 = vsel %vm330_vm2, %v327_v50, %v248_v48  ;;  %v332_v57 = vsel %vm330_vm2, %v328_v49, %v249_v0  ;;  %v2101_v0 = vld [vmem:[%s2664_s2 + $0x70] sm:$0xff] }
  0xa2   :  { %v1803_v46 = vpop.permute.xlu1 %1802  ;;  %v1798_v51 = vpop.permute.xlu0 %1797 }
  0xa3   :  { %v1805_v52 = vunpack.i.h.bf16 %v1803_v46  ;;  %v1804_v1 = vunpack.i.l.bf16 %v1803_v46  ;;  %v1800_v4 = vunpack.i.h.bf16 %v1798_v51  ;;  %v1799_v53 = vunpack.i.l.bf16 %v1798_v51 }
  0xa4   :  { %v1876_v51 = vmov 0  }
  0xa5   :  { %v261_v3 = vsel %vm259_vm13, %v1800_v4, %v2015_v45  ;;  %v260_v54 = vsel %vm259_vm13, %v1799_v53, %v1800_v4  ;;  %v273_v58 = vsel %vm271_vm14, %v1805_v52, %v2003_v61  ;;  %v272_v59 = vsel %vm271_vm14, %v1804_v1, %v1805_v52  ;;  %1821 = vset.pattern.permute.xlu1 %v1876_v51  ;;  %v71_v52 = vld [vmem:[%s2669_s7] sm:$0xf]  ;;  %v2093_v1 = vld [vmem:[%s2664_s2 + $0x78] sm:$0xff] }
  0xa6   :  { %v335_v60 = vsel %vm334_vm3, %v331_v56, %v260_v54  ;;  %v336_v62 = vsel %vm334_vm3, %v332_v57, %v261_v3  ;;  %v287_v45 = vsel %vm286_vm5, %v1809_v55, %v1810_v63  ;;  %1837 = vset.pattern.permute.xlu2 %v1876_v51  ;;  %574 = vperm.xlu1 %1821, %v71_v52   ;;  %v2107_v3 = vld [vmem:[%s2664_s2 + $0x68] sm:$0xff]  ;;  %v2113_v55 = vld [vmem:[%s2664_s2 + $0x60] sm:$0xff]  ;;  %v2118_v56 = vld [vmem:[%s2664_s2 + $0xf8] sm:$0xff]  ;;  %vm832_vm5 = vcmask 949248  }
  0xa7   :  { %v339_v6 = vsel %vm338_vm6, %v335_v60, %v272_v59  ;;  %v340_v8 = vsel %vm338_vm6, %v336_v62, %v273_v58  ;;  %1838 = vset.pattern.permute.xlu0 %v1876_v51  ;;  %v2125_v58 = vld [vmem:[%s2664_s2 + $0x58] sm:$0xff]  ;;  %v2130_v59 = vld [vmem:[%s2664_s2 + $0xf0] sm:$0xff] }
  0xa8   :  { %v343_v13 = vsel %vm342_vm7, %v339_v6, %v287_v45  ;;  %v344_v15 = vsel %vm342_vm7, %v340_v8, %v288_v11  ;;  %v2150_v6 = vld [vmem:[%s2664_s2 + $0x48] sm:$0xff]  ;;  %v2155_v8 = vld [vmem:[%s2664_s2 + $0xe0] sm:$0xff]  ;;  %v2175_v11 = vld [vmem:[%s2664_s2 + $0xd0] sm:$0xff]  ;;  %vm905_vm7 = vcmask 941056  }
  0xaa   :  { %v313_v5 = vpop.permute.xlu1 %312  ;;  %v1813_v26 = vpop.permute.xlu0 %1812 }
  0xab   :  { %v1815_v9 = vunpack.i.h.bf16 %v1813_v26  ;;  %v1814_v10 = vunpack.i.l.bf16 %v1813_v26  ;;  %v319_v61 = vsel %vm316_vm15, %v313_v5, %v315_v2  ;;  %v2137_v2 = vld [vmem:[%s2664_s2 + $0x50] sm:$0xff] }
  0xac   :  { %1681 = vmatmul.msk.f32.gmra.mxu2 %vm350_vm9, %v319_v61 }
  0xad   :  { %v302_v12 = vsel %vm301_vm4, %v1814_v10, %v1815_v9  ;;  %v303_v14 = vsel %vm301_vm4, %v1815_v9, %v2025_v7  ;;  %vm577_vm4 = vcmask 72704   ;;  %v2162_v10 = vld [vmem:[%s2664_s2 + $0xd8] sm:$0xff] }
  0xae   :  { %v347_v18 = vsel %vm346_vm8, %v343_v13, %v302_v12  ;;  %v348_v19 = vsel %vm346_vm8, %v344_v15, %v303_v14  ;;  %v2181_v13 = vld [vmem:[%s2664_s2 + $0x38] sm:$0xff]  ;;  %v2187_v14 = vld [vmem:[%s2664_s2 + $0xc8] sm:$0xff]  ;;  %v2193_v15 = vld [vmem:[%s2664_s2 + $0x30] sm:$0xff]  ;;  %vm1077_vm8 = vcmask 293888  }
  0xaf   :  { %381 = vmatmul.f32.vlgmr.msra.gmra.mxu0 %v347_v18  ;;  %404 = vmatmul.f32.vlgmr.msra.gmra.mxu1 %v348_v19 }
  0xb0   :  { %450 = vmatmul.f32.vlgmr.msra.gmra.mxu3 %v347_v18  ;;  %1685 = vmatpush.msk.msra.mxu0 %vm326_vm0, %v209_v16 }
  0xb1   :  { %712 = vmatpush.msra.mxu1 %v2118_v56 }
  0xb2   :  { %v1818_v21 = vpop.permute.xlu0 %1817  ;;  %552 = vmatpush.msra.mxu0 %v206_v20 }
  0xb3   :  { %v1820_v22 = vunpack.i.h.bf16 %v1818_v21  ;;  %v1819_v23 = vunpack.i.l.bf16 %v1818_v21  ;;  %713 = vmatpush.msra.mxu1 %v2130_v59 }
  0xb4   :  { %473 = vmatmul.f32.vlgmr.msrb.gmra.mxu2 %v348_v19  ;;  %553 = vmatpush.msra.mxu0 %v203_v24 }
  0xb5   :  { %v317_v7 = vsel %vm316_vm15, %v1819_v23, %v1820_v22  ;;  %v318_v28 = vsel %vm316_vm15, %v1820_v22, %v313_v5  ;;  %v2142_v5 = vld [vmem:[%s2664_s2 + $0xe8] sm:$0xff] }
  0xb6   :  { %554 = vmatpush.msra.mxu0 %v200_v25  ;;  %714 = vmatpush.msra.mxu1 %v2142_v5  ;;  %v2213_v23 = vld [vmem:[%s2664_s2 + $0x28] sm:$0xff]  ;;  %v2218_v25 = vld [vmem:[%s2664_s2 + $0xc0] sm:$0xff] }
  0xb7   :  { %384 = vmatmul.f32.gmra.mxu0 %v317_v7  ;;  %407 = vmatmul.f32.gmra.mxu1 %v318_v28 }
  0xb8   :  { %453 = vmatmul.f32.gmra.mxu3 %v317_v7  ;;  %555 = vmatpush.msra.mxu0 %v197_v29  ;;  %v2235_v29 = vld [vmem:[%s2664_s2 + $0x18] sm:$0xff] }
  0xb9   :  { %715 = vmatpush.msra.mxu1 %v2155_v8 }
  0xba   :  { %556 = vmatpush.msra.mxu0 %v194_v30  ;;  %v2240_v30 = vld [vmem:[%s2664_s2 + $0xb0] sm:$0xff] }
  0xbb   :  { %716 = vmatpush.msra.mxu1 %v2162_v10 }
  0xbc   :  { %476 = vmatmul.f32.gmra.mxu2 %v318_v28  ;;  %557 = vmatpush.msra.mxu0 %v191_v31  ;;  %v2248_v31 = vld [vmem:[%s2664_s2 + $0x10] sm:$0xff] }
  0xbd   :  { %717 = vmatpush.msra.mxu1 %v2175_v11 }
  0xbe   :  { %558 = vmatpush.msra.mxu0 %v188_v32  ;;  %v2253_v32 = vld [vmem:[%s2664_s2 + $0xa8] sm:$0xff] }
  0xbf   :  { %1683 = vmatmul.msk.f32.vlgmr.msrb.gmra.mxu0 %vm350_vm9, %v2035_v17  ;;  %519 = vmatmul.f32.vlgmr.msrb.gmra.mxu1 %v347_v18 }
  0xc0   :  { %542 = vmatmul.f32.vlgmr.msrb.gmra.mxu3 %v348_v19  ;;  %559 = vmatpush.msra.mxu0 %v185_v33  ;;  %v2265_v33 = vld [vmem:[%s2664_s2 + $0x8] sm:$0xff] }
  0xc1   :  { %718 = vmatpush.msra.mxu1 %v2187_v14 }
  0xc2   :  { %560 = vmatpush.msra.mxu0 %v182_v34  ;;  %v2270_v34 = vld [vmem:[%s2664_s2 + $0xa0] sm:$0xff] }
  0xc3   :  { %719 = vmatpush.msra.mxu1 %v2218_v25 }
  0xc4   :  { %561 = vmatpush.msra.mxu0 %v179_v35  ;;  %v2277_v35 = vld [vmem:[%s2664_s2] sm:$0xff] }
  0xc6   :  { %562 = vmatpush.msra.mxu0 %v176_v36  ;;  %v2282_v36 = vld [vmem:[%s2664_s2 + $0x98] sm:$0xff] }
  0xc7   :  { %1684 = vmatmul.msk.f32.gmra.mxu0 %vm350_vm9, %v319_v61  ;;  %522 = vmatmul.f32.gmra.mxu1 %v317_v7  ;;  %v2223_v7 = vld [vmem:[%s2664_s2 + $0x20] sm:$0xff] }
  0xc8   :  { %545 = vmatmul.f32.gmra.mxu3 %v318_v28  ;;  %563 = vmatpush.msra.mxu0 %v173_v37  ;;  %v2230_v28 = vld [vmem:[%s2664_s2 + $0xb8] sm:$0xff]  ;;  %v2287_v37 = vld [vmem:[%s2664_s2 + $0x90] sm:$0xff] }
  0xc9   :  { %720 = vmatpush.msra.mxu1 %v2230_v28 }
  0xca   :  { %564 = vmatpush.msra.mxu0 %v170_v38  ;;  %v2297_v38 = vld [vmem:[%s2664_s2 + $0x88] sm:$0xff] }
  0xcb   :  { %721 = vmatpush.msra.mxu1 %v2240_v30 }
  0xcc   :  { %766 = vmatpush.msrb.mxu0 %v2093_v1 }
  0xcd   :  { %722 = vmatpush.msra.mxu1 %v2253_v32 }
  0xce   :  { %767 = vmatpush.msrb.mxu0 %v2101_v0 }
  0xcf   :  { %1686 = vmatmul.msk.f32.vlgmr.msra.gmra.mxu0 %vm350_vm9, %v2035_v17  ;;  %v2085_v17 = vld [vmem:[%s2668_s6] sm:$0xf]  ;;  %723 = vmatpush.msra.mxu1 %v2270_v34 }
  0xd0   :  { %768 = vmatpush.msrb.mxu0 %v2107_v3 }
  0xd1   :  { %724 = vmatpush.msra.mxu1 %v2282_v36 }
  0xd2   :  { %769 = vmatpush.msrb.mxu0 %v2113_v55 }
  0xd3   :  { %725 = vmatpush.msra.mxu1 %v2287_v37 }
  0xd4   :  { %770 = vmatpush.msrb.mxu0 %v2125_v58 }
  0xd5   :  { %726 = vmatpush.msra.mxu1 %v2297_v38 }
  0xd6   :  { %771 = vmatpush.msrb.mxu0 %v2137_v2 }
  0xd7   :  { %1687 = vmatmul.msk.f32.gmra.mxu0 %vm350_vm9, %v319_v61  ;;  %v2169_v61 = vld [vmem:[%s2664_s2 + $0x40] sm:$0xff]  ;;  %vm1580_vm9 = vcmask 982016  }
  0xd8   :  { %772 = vmatpush.msrb.mxu0 %v2150_v6 }
  0xda   :  { %773 = vmatpush.msrb.mxu0 %v2169_v61 }
  0xdc   :  { %774 = vmatpush.msrb.mxu0 %v2181_v13 }
  0xde   :  { %775 = vmatpush.msrb.mxu0 %v2193_v15 }
  0xe0   :  { %776 = vmatpush.msrb.mxu0 %v2213_v23 }
  0xe2   :  { %777 = vmatpush.msrb.mxu0 %v2223_v7 }
  0xe4   :  { %778 = vmatpush.msrb.mxu0 %v2235_v29 }
  0xe6   :  { %779 = vmatpush.msrb.mxu0 %v2248_v31 }
  0xe8   :  { %780 = vmatpush.msrb.mxu0 %v2265_v33 }
  0xea   :  { %781 = vmatpush.msrb.mxu0 %v2277_v35 }
 0x119   :  { %v428_v39 = vpop.f32.mrf.mxu2 }
 0x12c   :  { %v382_v40 = vpop.f32.mrf.mxu0  ;;  %v405_v41 = vpop.f32.mrf.mxu1 }
 0x12d   :  { %v406_v47 = vadd.f32 %v405_v41, %v382_v40  ;;  %v684_v40 = vld [vmem:[%s2664_s2 + $0x110] sm:$0x7]  ;;  %v2315_v41 = vpop.permute.xlu1 %574 }
 0x12e   :  { %1694 = vmatpush.msk.msra.mxu3 %vm330_vm2, %v684_v40  ;;  %1698 = vmatpush.msk.msra.mxu0 %vm330_vm2, %v684_v40 }
 0x12f   :  { %v431_v42 = vpop.f32.mrf.mxu2  ;;  %v429_v46 = vadd.f32 %v428_v39, %v406_v47  ;;  %v2302_v39 = vld [vmem:[%s2664_s2 + $0x80] sm:$0xff] }
 0x130   :  { %727 = vmatpush.msra.mxu1 %v2302_v39 }
 0x132   :  { %839 = vmatpush.msrb.mxu1 %v2093_v1 }
 0x133   :  { %v451_v43 = vpop.f32.mrf.mxu3 }
 0x134   :  { %v385_v44 = vpop.f32.mrf.mxu0  ;;  %v408_v27 = vpop.f32.mrf.mxu1  ;;  %840 = vmatpush.msrb.mxu1 %v2101_v0 }
 0x135   :  { %v409_v48 = vadd.f32 %v408_v27, %v385_v44 }
 0x136   :  { %841 = vmatpush.msrb.mxu1 %v2107_v3 }
 0x137   :  { %v432_v49 = vadd.f32 %v431_v42, %v409_v48  ;;  %v474_v50 = vpop.f32.mrf.mxu2  ;;  %v683_v42 = vld [vmem:[%s2664_s2 + $0x108] sm:$0xff] }
 0x138   :  { %v475_v62 = vadd.f32 %v474_v50, %v451_v43  ;;  %842 = vmatpush.msrb.mxu1 %v2113_v55  ;;  %746 = vmatpush.msra.mxu3 %v683_v42  ;;  %v682_v43 = vld [vmem:[%s2664_s2 + $0x100] sm:$0xff]  ;;  %s1877_s2 = smov 116  }
 0x139   :  { %1688 = vmatpush.msk.msra.mxu2 %vm322_vm1, %v432_v49  ;;  %893 = vmatpush.msra.mxu0 %v683_v42 }
 0x13a   :  { %843 = vmatpush.msrb.mxu1 %v2125_v58  ;;  %747 = vmatpush.msra.mxu3 %v682_v43 }
 0x13b   :  { %605 = vmatpush.msra.mxu2 %v429_v46  ;;  %v454_v4 = vpop.f32.mrf.mxu3  ;;  %894 = vmatpush.msra.mxu0 %v682_v43 }
 0x13c   :  { %v497_v53 = vpop.f32.mrf.mxu0  ;;  %1689 = vmatmul.msk.f32.vlgmr.msra.gmra.mxu2 %vm577_vm4, %v2085_v17  ;;  %v520_v9 = vpop.f32.mrf.mxu1  ;;  %786 = vmatpush.msrb.mxu3 %v2118_v56 }
 0x13d   :  { %v498_v45 = vadd.f32 %v497_v53, %v475_v62  ;;  %844 = vmatpush.msrb.mxu1 %v2137_v2 }
 0x13e   :  { %787 = vmatpush.msrb.mxu3 %v2130_v59 }
 0x13f   :  { %v477_v54 = vpop.f32.mrf.mxu2  ;;  %845 = vmatpush.msrb.mxu1 %v2150_v6 }
 0x140   :  { %v478_v57 = vadd.f32 %v477_v54, %v454_v4  ;;  %788 = vmatpush.msrb.mxu3 %v2142_v5 }
 0x141   :  { %846 = vmatpush.msrb.mxu1 %v2169_v61 }
 0x142   :  { %789 = vmatpush.msrb.mxu3 %v2155_v8 }
 0x143   :  { %v543_v26 = vpop.f32.mrf.mxu3  ;;  %847 = vmatpush.msrb.mxu1 %v2181_v13 }
 0x144   :  { %v500_v60 = vpop.f32.mrf.mxu0  ;;  %v523_v18 = vpop.f32.mrf.mxu1  ;;  %v544_v24 = vadd.f32 %v543_v26, %v520_v9  ;;  %790 = vmatpush.msrb.mxu3 %v2162_v10 }
 0x145   :  { %v501_v63 = vadd.f32 %v500_v60, %v478_v57  ;;  %848 = vmatpush.msrb.mxu1 %v2193_v15 }
 0x146   :  { %791 = vmatpush.msrb.mxu3 %v2175_v11 }
 0x147   :  { %1690 = vmatpush.msk.msrb.mxu2 %vm322_vm1, %v501_v63  ;;  %849 = vmatpush.msrb.mxu1 %v2213_v23 }
 0x148   :  { %792 = vmatpush.msrb.mxu3 %v2187_v14 }
 0x149   :  { %625 = vmatpush.msrb.mxu2 %v498_v45  ;;  %850 = vmatpush.msrb.mxu1 %v2223_v7 }
 0x14a   :  { %1691 = vmatmul.msk.f32.vlgmr.msrb.gmra.mxu2 %vm577_vm4, %v2085_v17  ;;  %793 = vmatpush.msrb.mxu3 %v2218_v25 }
 0x14b   :  { %v546_v16 = vpop.f32.mrf.mxu3  ;;  %851 = vmatpush.msrb.mxu1 %v2235_v29 }
 0x14c   :  { %v566_v12 = vpop.f32.mrf.mxu0  ;;  %v547_v19 = vadd.f32 %v546_v16, %v523_v18  ;;  %794 = vmatpush.msrb.mxu3 %v2230_v28  ;;  %v985_v16 = vld [vmem:[%s2665_s3 + $0x28] sm:$0xff] }
 0x14d   :  { %v567_v22 = vadd.f32 %v566_v12, %v544_v24  ;;  %852 = vmatpush.msrb.mxu1 %v2248_v31 }
 0x14e   :  { %795 = vmatpush.msrb.mxu3 %v2240_v30 }
 0x14f   :  { %853 = vmatpush.msrb.mxu1 %v2265_v33 }
 0x150   :  { %796 = vmatpush.msrb.mxu3 %v2253_v32 }
 0x151   :  { %854 = vmatpush.msrb.mxu1 %v2277_v35 }
 0x152   :  { %797 = vmatpush.msrb.mxu3 %v2270_v34 }
 0x154   :  { %v569_v20 = vpop.f32.mrf.mxu0  ;;  %798 = vmatpush.msrb.mxu3 %v2282_v36 }
 0x155   :  { %v570_v21 = vadd.f32 %v569_v20, %v547_v19 }
 0x156   :  { %799 = vmatpush.msrb.mxu3 %v2287_v37 }
 0x157   :  { %1692 = vmatpush.msk.msra.mxu2 %vm322_vm1, %v570_v21  ;;  %vm685_vm1 = vcmask 154624  }
 0x158   :  { %800 = vmatpush.msrb.mxu3 %v2297_v38 }
 0x159   :  { %645 = vmatpush.msra.mxu2 %v567_v22  ;;  %v984_v22 = vld [vmem:[%s2665_s3 + $0x20] sm:$0xff] }
 0x15a   :  { %1693 = vmatmul.msk.f32.vlgmr.msra.gmra.mxu2 %vm577_vm4, %v2085_v17  ;;  %801 = vmatpush.msrb.mxu3 %v2302_v39 }
 0x15b   :  { %692 = vmatpush.msrb.mxu2 %v2093_v1 }
 0x15d   :  { %693 = vmatpush.msrb.mxu2 %v2101_v0 }
 0x15f   :  { %694 = vmatpush.msrb.mxu2 %v2107_v3 }
 0x161   :  { %695 = vmatpush.msrb.mxu2 %v2113_v55 }
 0x163   :  { %696 = vmatpush.msrb.mxu2 %v2125_v58 }
 0x165   :  { %697 = vmatpush.msrb.mxu2 %v2137_v2 }
 0x167   :  { %698 = vmatpush.msrb.mxu2 %v2150_v6 }
 0x169   :  { %699 = vmatpush.msrb.mxu2 %v2169_v61 }
 0x16b   :  { %700 = vmatpush.msrb.mxu2 %v2181_v13 }
 0x16d   :  { %701 = vmatpush.msrb.mxu2 %v2193_v15 }
 0x16f   :  { %702 = vmatpush.msrb.mxu2 %v2213_v23 }
 0x171   :  { %703 = vmatpush.msrb.mxu2 %v2223_v7 }
 0x173   :  { %704 = vmatpush.msrb.mxu2 %v2235_v29 }
 0x175   :  { %705 = vmatpush.msrb.mxu2 %v2248_v31 }
 0x177   :  { %706 = vmatpush.msrb.mxu2 %v2265_v33 }
 0x179   :  { %707 = vmatpush.msrb.mxu2 %v2277_v35 }
 0x17b   :  { %1696 = vmatpush.msk.msra.mxu2 %vm330_vm2, %v684_v40 }
 0x17d   :  { %820 = vmatpush.msra.mxu2 %v683_v42 }
 0x17f   :  { %821 = vmatpush.msra.mxu2 %v682_v43 }
 0x1bf   :  { %v607_v44 = vpop.f32.mrf.mxu2 }
 0x1c0   :  { %v608_v27 = vadd.f32 %v607_v44, %v2315_v41 }
 0x1c2   :  { %708 = vmatmul.f32.vlgmr.msrb.gmra.mxu2 %v608_v27 }
 0x1c3   :  { %859 = vmatpush.msrb.mxu2 %v2118_v56 }
 0x1c5   :  { %860 = vmatpush.msrb.mxu2 %v2130_v59 }
 0x1c7   :  { %861 = vmatpush.msrb.mxu2 %v2142_v5 }
 0x1c9   :  { %862 = vmatpush.msrb.mxu2 %v2155_v8 }
 0x1cb   :  { %863 = vmatpush.msrb.mxu2 %v2162_v10 }
 0x1cd   :  { %v627_v47 = vpop.f32.mrf.mxu2  ;;  %864 = vmatpush.msrb.mxu2 %v2175_v11 }
 0x1ce   :  { %v628_v48 = vadd.f32 %v627_v47, %v2315_v41 }
 0x1cf   :  { %865 = vmatpush.msrb.mxu2 %v2187_v14 }
 0x1d0   :  { %v1822_v49 = vpack.i.bf16 %v628_v48, %v608_v27  ;;  %728 = vmatmul.f32.vlgmr.msra.gmra.mxu1 %v628_v48 }
 0x1d1   :  { %866 = vmatpush.msrb.mxu2 %v2218_v25  ;;  %1700 = vmatpush.msk.msra.mxu1 %vm330_vm2, %v684_v40 }
 0x1d2   :  { %1823 = vrot.lane.b32.xlu2 %v1822_v49, %s1869_s1 }
 0x1d3   :  { %867 = vmatpush.msrb.mxu2 %v2230_v28  ;;  %966 = vmatpush.msra.mxu1 %v683_v42 }
 0x1d5   :  { %868 = vmatpush.msrb.mxu2 %v2240_v30  ;;  %967 = vmatpush.msra.mxu1 %v682_v43 }
 0x1d7   :  { %869 = vmatpush.msrb.mxu2 %v2253_v32 }
 0x1d9   :  { %870 = vmatpush.msrb.mxu2 %v2270_v34 }
 0x1da   :  { %1828 = vrot.lane.b32.xlu2 %v1822_v49, %s1877_s2 }
 0x1db   :  { %871 = vmatpush.msrb.mxu2 %v2282_v36 }
 0x1dd   :  { %v647_v50 = vpop.f32.mrf.mxu2  ;;  %872 = vmatpush.msrb.mxu2 %v2287_v37 }
 0x1de   :  { %v648_v46 = vadd.f32 %v647_v50, %v2315_v41 }
 0x1df   :  { %873 = vmatpush.msrb.mxu2 %v2297_v38 }
 0x1e0   :  { %830 = vrot.lane.b32.xlu1 %v648_v46, %s1877_s2  ;;  %758 = vrot.lane.b32.xlu0 %v648_v46, %s1869_s1 }
 0x1e1   :  { %1695 = vmatmul.msk.f32.vlgmr.msra.gmra.mxu3 %vm685_vm1, %v648_v46  ;;  %874 = vmatpush.msrb.mxu2 %v2302_v39 }
 0x1e2   :  { %912 = vmatpush.msra.mxu3 %v2093_v1 }
 0x1e4   :  { %913 = vmatpush.msra.mxu3 %v2101_v0 }
 0x1e6   :  { %914 = vmatpush.msra.mxu3 %v2107_v3 }
 0x1e8   :  { %903 = vrot.lane.b32.xlu1 %v648_v46, %s1878_s22  ;;  %1833 = vrot.lane.b32.xlu0 %v1822_v49, %s1878_s22 }
 0x1e9   :  { %915 = vmatpush.msra.mxu3 %v2113_v55 }
 0x1eb   :  { %916 = vmatpush.msra.mxu3 %v2125_v58 }
 0x1ed   :  { %917 = vmatpush.msra.mxu3 %v2137_v2 }
 0x1ef   :  { %918 = vmatpush.msra.mxu3 %v2150_v6 }
 0x1f1   :  { %919 = vmatpush.msra.mxu3 %v2169_v61 }
 0x1f3   :  { %920 = vmatpush.msra.mxu3 %v2181_v13  ;;  %v987_v13 = vld [vmem:[%s2665_s3 + $0x38] sm:$0x3] }
 0x1f5   :  { %921 = vmatpush.msra.mxu3 %v2193_v15 }
 0x1f7   :  { %922 = vmatpush.msra.mxu3 %v2213_v23 }
 0x1f9   :  { %923 = vmatpush.msra.mxu3 %v2223_v7 }
 0x1fb   :  { %924 = vmatpush.msra.mxu3 %v2235_v29  ;;  %v983_v29 = vld [vmem:[%s2665_s3 + $0x18] sm:$0xff] }
 0x1fd   :  { %925 = vmatpush.msra.mxu3 %v2248_v31 }
 0x1ff   :  { %926 = vmatpush.msra.mxu3 %v2265_v33 }
 0x201   :  { %927 = vmatpush.msra.mxu3 %v2277_v35 }
 0x22c   :  { %v1824_v17 = vpop.permute.xlu2 %1823 }
 0x22d   :  { %v1826_v51 = vunpack.i.h.bf16 %v1824_v17  ;;  %v1825_v52 = vunpack.i.l.bf16 %v1824_v17 }
 0x22f   :  { %v760_v1 = vsel %vm223_vm10, %v1825_v52, %v1826_v51 }
 0x230   :  { %782 = vmatmul.f32.vlgmr.msrb.gmra.mxu0 %v760_v1  ;;  %v979_v1 = vld [vmem:[%s2671_s9 + $0x8] sm:$0xff] }
 0x231   :  { %932 = vmatpush.msrb.mxu0 %v2118_v56 }
 0x233   :  { %933 = vmatpush.msrb.mxu0 %v2130_v59 }
 0x234   :  { %v1829_v4 = vpop.permute.xlu2 %1828 }
 0x235   :  { %v1831_v53 = vunpack.i.h.bf16 %v1829_v4  ;;  %v1830_v0 = vunpack.i.l.bf16 %v1829_v4  ;;  %934 = vmatpush.msrb.mxu0 %v2142_v5  ;;  %v1113_v4 = vld [vmem:[%s2666_s4 + $0x18] sm:$0x7] }
 0x237   :  { %v833_v3 = vsel %vm832_vm5, %v1830_v0, %v1831_v53  ;;  %935 = vmatpush.msrb.mxu0 %v2155_v8 }
 0x238   :  { %855 = vmatmul.f32.vlgmr.msrb.gmra.mxu1 %v833_v3 }
 0x239   :  { %936 = vmatpush.msrb.mxu0 %v2162_v10 }
 0x23b   :  { %937 = vmatpush.msrb.mxu0 %v2175_v11 }
 0x23d   :  { %938 = vmatpush.msrb.mxu0 %v2187_v14  ;;  %v986_v14 = vld [vmem:[%s2665_s3 + $0x30] sm:$0xff] }
 0x23f   :  { %939 = vmatpush.msrb.mxu0 %v2218_v25 }
 0x241   :  { %940 = vmatpush.msrb.mxu0 %v2230_v28 }
 0x243   :  { %941 = vmatpush.msrb.mxu0 %v2240_v30 }
 0x245   :  { %942 = vmatpush.msrb.mxu0 %v2253_v32  ;;  %v709_v5 = vpop.f32.mrf.mxu2  ;;  %v982_v32 = vld [vmem:[%s2665_s3 + $0x10] sm:$0xff] }
 0x247   :  { %943 = vmatpush.msrb.mxu0 %v2270_v34  ;;  %v981_v34 = vld [vmem:[%s2665_s3 + $0x8] sm:$0xff] }
 0x249   :  { %944 = vmatpush.msrb.mxu0 %v2282_v36 }
 0x24b   :  { %945 = vmatpush.msrb.mxu0 %v2287_v37  ;;  %v978_v37 = vld [vmem:[%s2671_s9] sm:$0xff] }
 0x24d   :  { %946 = vmatpush.msrb.mxu0 %v2297_v38  ;;  %v729_v6 = vpop.f32.mrf.mxu1  ;;  %v980_v38 = vld [vmem:[%s2665_s3] sm:$0xff] }
 0x24e   :  { %v730_v20 = vadd.f32 %v729_v6, %v709_v5 }
 0x24f   :  { %947 = vmatpush.msrb.mxu0 %v2302_v39 }
 0x252   :  { %v831_v54 = vpop.permute.xlu1 %830  ;;  %v759_v55 = vpop.permute.xlu0 %758 }
 0x253   :  { %v761_v56 = vsel %vm223_vm10, %v1826_v51, %v759_v55  ;;  %1697 = vmatmul.msk.f32.vlgmr.msra.gmra.mxu2 %vm685_vm1, %v759_v55  ;;  %1699 = vmatmul.msk.f32.vlgmr.msra.gmra.mxu0 %vm685_vm1, %v831_v54  ;;  %v834_v57 = vsel %vm832_vm5, %v1831_v53, %v831_v54  ;;  %v1112_v53 = vld [vmem:[%s2666_s4 + $0x10] sm:$0xff]  ;;  %v976_v54 = vld [vmem:[%s2670_s8] sm:$0xff]  ;;  %v977_v55 = vld [vmem:[%s2670_s8 + $0x8] sm:$0xff]  ;;  %s1882_s8 = smov 123   ;;  %vm1640_vm10 = vcmask 261120  }
 0x254   :  { %802 = vmatmul.f32.vlgmr.msrb.gmra.mxu3 %v761_v56  ;;  %1702 = vmatpush.msk.msra.mxu2 %vm326_vm0, %v987_v13  ;;  %vm1017_vm0 = vcmask 474112   ;;  %v1111_v56 = vld [vmem:[%s2666_s4 + $0x8] sm:$0xff] }
 0x255   :  { %1711 = vmatpush.msk.msrb.mxu3 %vm330_vm2, %v1113_v4  ;;  %1714 = vmatpush.msk.msra.mxu0 %vm330_vm2, %v1113_v4 }
 0x256   :  { %1044 = vmatpush.msra.mxu2 %v986_v14 }
 0x257   :  { %1137 = vmatpush.msrb.mxu3 %v1112_v53  ;;  %1168 = vmatpush.msra.mxu0 %v1112_v53 }
 0x258   :  { %1045 = vmatpush.msra.mxu2 %v985_v16 }
 0x259   :  { %1138 = vmatpush.msrb.mxu3 %v1111_v56  ;;  %1169 = vmatpush.msra.mxu0 %v1111_v56 }
 0x25a   :  { %v904_v58 = vpop.permute.xlu1 %903  ;;  %v1834_v59 = vpop.permute.xlu0 %1833  ;;  %1046 = vmatpush.msra.mxu2 %v984_v22 }
 0x25b   :  { %v1836_v60 = vunpack.i.h.bf16 %v1834_v59  ;;  %v1835_v62 = vunpack.i.l.bf16 %v1834_v59  ;;  %875 = vmatmul.f32.vlgmr.msrb.gmra.mxu2 %v834_v57  ;;  %1701 = vmatmul.msk.f32.vlgmr.msra.gmra.mxu1 %vm685_vm1, %v904_v58  ;;  %v1110_v57 = vld [vmem:[%s2666_s4] sm:$0xff] }
 0x25c   :  { %1047 = vmatpush.msra.mxu2 %v983_v29  ;;  %1139 = vmatpush.msrb.mxu3 %v1110_v57  ;;  %v1273_v29 = vld [vmem:[%s2673_s11 + $0x50] sm:$0xff] }
 0x25d   :  { %v906_v63 = vsel %vm905_vm7, %v1835_v62, %v1836_v60  ;;  %v907_v2 = vsel %vm905_vm7, %v1836_v60, %v904_v58  ;;  %1170 = vmatpush.msra.mxu0 %v1110_v57 }
 0x25e   :  { %928 = vmatmul.f32.vlgmr.msra.gmra.mxu3 %v906_v63  ;;  %948 = vmatmul.f32.vlgmr.msrb.gmra.mxu0 %v907_v2 }
 0x25f   :  { %1048 = vmatpush.msra.mxu2 %v982_v32  ;;  %1717 = vmatpush.msk.msra.mxu3 %vm330_vm2, %v1113_v4  ;;  %v1274_v32 = vld [vmem:[%s2673_s11 + $0x58] sm:$0xff] }
 0x261   :  { %1049 = vmatpush.msra.mxu2 %v981_v34  ;;  %1199 = vmatpush.msra.mxu3 %v1112_v53  ;;  %v1271_v34 = vld [vmem:[%s2673_s11 + $0x40] sm:$0xff] }
 0x263   :  { %1050 = vmatpush.msra.mxu2 %v980_v38  ;;  %1200 = vmatpush.msra.mxu3 %v1111_v56  ;;  %v1265_v38 = vld [vmem:[%s2673_s11 + $0x10] sm:$0xff] }
 0x264   :  { %v749_v26 = vpop.f32.mrf.mxu3 }
 0x265   :  { %v750_v25 = vadd.f32 %v749_v26, %v730_v20  ;;  %1201 = vmatpush.msra.mxu3 %v1110_v57 }
 0x2ad   :  { %v783_v45 = vpop.f32.mrf.mxu0 }
 0x2b5   :  { %v856_v61 = vpop.f32.mrf.mxu1 }
 0x2d0   :  { %v896_v9 = vpop.f32.mrf.mxu0 }
 0x2d6   :  { %v823_v8 = vpop.f32.mrf.mxu2 }
 0x2d7   :  { %v803_v10 = vpop.f32.mrf.mxu3 }
 0x2d8   :  { %v804_v11 = vadd.f32 %v803_v10, %v783_v45  ;;  %v969_v23 = vpop.f32.mrf.mxu1  ;;  %v1278_v10 = vld [vmem:[%s2667_s5] sm:$0x1f]  ;;  %s1884_s5 = smov 125  }
 0x2d9   :  { %1723 = vmatpush.msk.msrb.mxu0 %vm338_vm6, %v1278_v10  ;;  %vm1429_vm6 = vcmask 523264   ;;  %v1261_v10 = vld [vmem:[%s2672_s10 + $0x68] sm:$0xff] }
 0x2da   :  { %v824_v24 = vadd.f32 %v823_v8, %v804_v11 }
 0x2db   :  { %v949_v18 = vpop.f32.mrf.mxu0 }
 0x2dc   :  { %v972_v30 = vmax.f32 %v750_v25, %v824_v24 }
 0x2de   :  { %v876_v12 = vpop.f32.mrf.mxu2 }
 0x2df   :  { %v877_v15 = vadd.f32 %v876_v12, %v856_v61 }
 0x2e1   :  { %v929_v19 = vpop.f32.mrf.mxu3  ;;  %v897_v7 = vadd.f32 %v896_v9, %v877_v15 }
 0x2e2   :  { %v950_v21 = vadd.f32 %v949_v18, %v929_v19 }
 0x2e4   :  { %v970_v28 = vadd.f32 %v969_v23, %v950_v21 }
 0x2e6   :  { %v973_v31 = vmax.f32 %v897_v7, %v970_v28  ;;  %v1275_v28 = vld [vmem:[%s2673_s11 + $0x60] sm:$0xff] }
 0x2e8   :  { %v974_v33 = vmax.f32 %v972_v30, %v973_v31  ;;  %v1276_v30 = vld [vmem:[%s2673_s11 + $0x68] sm:$0xff]  ;;  %v1270_v31 = vld [vmem:[%s2673_s11 + $0x38] sm:$0xff] }
 0x2ea   :  { %v975_v35 = vmax.f32 %v974_v33, 0.0  ;;  %v1267_v33 = vld [vmem:[%s2673_s11 + $0x20] sm:$0xff] }
 0x2ec   :  { %993 = vrot.lane.b32.xlu0 %v975_v35, %s1872_s19  ;;  %v989_v36 = vrot.slane %v975_v35, 4 }
 0x2ee   :  { %996 = vrot.lane.b32.xlu1 %v989_v36, %s1879_s23  ;;  %990 = vrot.lane.b32.xlu2 %v989_v36, %s1869_s1 }
 0x2f4   :  { %1002 = vrot.lane.b32.xlu0 %v989_v36, %s1880_s24 }
 0x2f6   :  { %1005 = vrot.lane.b32.xlu1 %v975_v35, %s1877_s2  ;;  %999 = vrot.lane.b32.xlu2 %v975_v35, %s1881_s25  ;;  %s1883_s25 = smov 124  }
 0x2fc   :  { %1011 = vrot.lane.b32.xlu0 %v975_v35, %s1868_s0 }
 0x2fe   :  { %1069 = vperm.xlu1 %1821, %v978_v37   ;;  %1008 = vrot.lane.b32.xlu2 %v989_v36, %s1878_s22  ;;  %v1268_v36 = vld [vmem:[%s2673_s11 + $0x28] sm:$0xff]  ;;  %v1558_v37 = vld [vmem:[%s2675_s13 + $0x10] sm:$0xff] }
 0x306   :  { %1074 = vperm.xlu2 %1837, %v979_v1  }
 0x348   :  { %v991_v39 = vpop.permute.xlu2 %990 }
 0x349   :  { %v1013_v40 = vsel %vm334_vm3, %v975_v35, %v991_v39  ;;  %v1264_v35 = vld [vmem:[%s2673_s11 + $0x8] sm:$0xff]  ;;  %v1628_v39 = vld [vmem:[%s2677_s15] sm:$0xff] }
 0x34a   :  { %1703 = vmatmul.msk.f32.vlgmr.msra.gmra.mxu2 %vm1017_vm0, %v1013_v40  ;;  %v1559_v40 = vld [vmem:[%s2675_s13 + $0x18] sm:$0xff] }
 0x350   :  { %v1000_v44 = vpop.permute.xlu2 %999 }
 0x358   :  { %v1009_v49 = vpop.permute.xlu2 %1008 }
 0x35e   :  { %v994_v41 = vpop.permute.xlu0 %993 }
 0x360   :  { %v997_v42 = vpop.permute.xlu1 %996  ;;  %v1075_v62 = vpop.permute.xlu2 %1074 }
 0x361   :  { %v1014_v43 = vsel %vm334_vm3, %v994_v41, %v997_v42  ;;  %v1556_v41 = vld [vmem:[%s2675_s13] sm:$0xff] }
 0x362   :  { %1704 = vmatmul.msk.f32.gmra.mxu2 %vm1017_vm0, %v1014_v43 }
 0x366   :  { %v1003_v27 = vpop.permute.xlu0 %1002 }
 0x367   :  { %v1015_v47 = vsel %vm334_vm3, %v1000_v44, %v1003_v27 }
 0x368   :  { %v1006_v48 = vpop.permute.xlu1 %1005 }
 0x369   :  { %v1016_v50 = vsel %vm334_vm3, %v1006_v48, %v1009_v49 }
 0x36a   :  { %1705 = vmatmul.msk.f32.gmra.mxu2 %vm1017_vm0, %v1015_v47 }
 0x36e   :  { %v1012_v46 = vpop.permute.xlu0 %1011 }
 0x370   :  { %v1070_v58 = vpop.permute.xlu1 %1069 }
 0x372   :  { %1706 = vmatmul.msk.f32.gmra.mxu2 %vm1017_vm0, %v1016_v50 }
 0x37a   :  { %1707 = vmatmul.msk.f32.gmra.mxu2 %vm1017_vm0, %v1012_v46 }
 0x3cd   :  { %v1052_v17 = vpop.f32.mrf.mxu2 }
 0x3e5   :  { %v1055_v51 = vpop.f32.mrf.mxu2 }
 0x3ed   :  { %v1058_v52 = vpop.f32.mrf.mxu2 }
 0x3f5   :  { %v1061_v0 = vpop.f32.mrf.mxu2 }
 0x3fd   :  { %v1064_v3 = vpop.f32.mrf.mxu2 }
 0x3fe   :  { %1708 = vmatpush.msk.msrb.mxu1 %vm334_vm3, %v1064_v3  ;;  %vm1114_vm3 = vcmask 220160   ;;  %v1269_v3 = vld [vmem:[%s2673_s11 + $0x30] sm:$0xff] }
 0x400   :  { %1099 = vmatpush.msrb.mxu1 %v1061_v0  ;;  %v1272_v0 = vld [vmem:[%s2673_s11 + $0x48] sm:$0xff] }
 0x402   :  { %1100 = vmatpush.msrb.mxu1 %v1058_v52 }
 0x404   :  { %1101 = vmatpush.msrb.mxu1 %v1055_v51 }
 0x406   :  { %1102 = vmatpush.msrb.mxu1 %v1052_v17 }
 0x407   :  { %1709 = vmatmul.msk.f32.vlgmr.msrb.gmra.mxu1 %vm1077_vm8, %v976_v54  ;;  %v1248_v54 = vld [vmem:[%s2672_s10] sm:$0xff] }
 0x408   :  { %1720 = vmatpush.msk.msra.mxu1 %vm330_vm2, %v1113_v4  ;;  %vm1293_vm2 = vcmask 39936   ;;  %v1277_v4 = vld [vmem:[%s2673_s11 + $0x70] sm:$0xff] }
 0x40a   :  { %1230 = vmatpush.msra.mxu1 %v1112_v53 }
 0x40c   :  { %1231 = vmatpush.msra.mxu1 %v1111_v56  ;;  %v1266_v56 = vld [vmem:[%s2673_s11 + $0x18] sm:$0xff] }
 0x40e   :  { %1232 = vmatpush.msra.mxu1 %v1110_v57  ;;  %v1249_v57 = vld [vmem:[%s2672_s10 + $0x8] sm:$0xff] }
 0x40f   :  { %1710 = vmatmul.msk.f32.gmra.mxu1 %vm1077_vm8, %v977_v55  ;;  %v1255_v55 = vld [vmem:[%s2672_s10 + $0x38] sm:$0xff] }
 0x484   :  { %v1104_v59 = vpop.f32.mrf.mxu1 }
 0x485   :  { %v1105_v60 = vadd.f32 %v1104_v59, %v1070_v58  ;;  %v1256_v58 = vld [vmem:[%s2672_s10 + $0x40] sm:$0xff] }
 0x486   :  { %v1263_v59 = vld [vmem:[%s2673_s11] sm:$0xff] }
 0x487   :  { %1209 = vrot.lane.b32.xlu2 %v1105_v60, %s1882_s8  ;;  %1147 = vrot.lane.b32.xlu1 %v1105_v60, %s1869_s1 }
 0x488   :  { %1178 = vrot.lane.b32.xlu0 %v1105_v60, %s1883_s25  ;;  %1712 = vmatmul.msk.f32.vlgmr.msrb.gmra.mxu3 %vm1114_vm3, %v1105_v60  ;;  %v1250_v60 = vld [vmem:[%s2672_s10 + $0x10] sm:$0xff] }
 0x48c   :  { %v1107_v63 = vpop.f32.mrf.mxu1 }
 0x48d   :  { %v1108_v2 = vadd.f32 %v1107_v63, %v1075_v62  ;;  %v1257_v62 = vld [vmem:[%s2672_s10 + $0x48] sm:$0xff]  ;;  %v1251_v63 = vld [vmem:[%s2672_s10 + $0x18] sm:$0xff] }
 0x48f   :  { %1211 = vrot.lane.b32.xlu2 %v1108_v2, %s1882_s8  ;;  %1149 = vrot.lane.b32.xlu1 %v1108_v2, %s1869_s1 }
 0x490   :  { %1180 = vrot.lane.b32.xlu0 %v1108_v2, %s1883_s25  ;;  %1713 = vmatmul.msk.f32.gmra.mxu3 %vm1114_vm3, %v1108_v2  ;;  %v1258_v2 = vld [vmem:[%s2672_s10 + $0x50] sm:$0xff] }
 0x4e1   :  { %v1210_v5 = vpop.permute.xlu2 %1209 }
 0x4e2   :  { %1721 = vmatmul.msk.f32.vlgmr.msra.gmra.mxu1 %vm1114_vm3, %v1210_v5  ;;  %v1557_v5 = vld [vmem:[%s2675_s13 + $0x8] sm:$0xff] }
 0x4e9   :  { %v1212_v26 = vpop.permute.xlu2 %1211 }
 0x4ea   :  { %1722 = vmatmul.msk.f32.gmra.mxu1 %vm1114_vm3, %v1212_v26  ;;  %v1252_v26 = vld [vmem:[%s2672_s10 + $0x20] sm:$0xff] }
 0x4f9   :  { %v1148_v45 = vpop.permute.xlu1 %1147 }
 0x4fa   :  { %v1179_v6 = vpop.permute.xlu0 %1178  ;;  %1715 = vmatmul.msk.f32.vlgmr.msra.gmra.mxu0 %vm1114_vm3, %v1148_v45  ;;  %v1259_v45 = vld [vmem:[%s2672_s10 + $0x58] sm:$0xff] }
 0x4fb   :  { %1718 = vmatmul.msk.f32.vlgmr.msra.gmra.mxu3 %vm1114_vm3, %v1179_v6  ;;  %v1629_v6 = vld [vmem:[%s2677_s15 + $0x8] sm:$0x3] }
 0x501   :  { %v1150_v8 = vpop.permute.xlu1 %1149 }
 0x502   :  { %v1181_v9 = vpop.permute.xlu0 %1180  ;;  %1716 = vmatmul.msk.f32.gmra.mxu0 %vm1114_vm3, %v1150_v8  ;;  %v1253_v8 = vld [vmem:[%s2672_s10 + $0x28] sm:$0xff] }
 0x503   :  { %1719 = vmatmul.msk.f32.gmra.mxu3 %vm1114_vm3, %v1181_v9  ;;  %v1260_v9 = vld [vmem:[%s2672_s10 + $0x60] sm:$0xff] }
 0x50b   :  { %v1141_v61 = vpop.f32.mrf.mxu3 }
 0x513   :  { %v1144_v11 = vpop.f32.mrf.mxu3 }
 0x55f   :  { %v1234_v13 = vpop.f32.mrf.mxu1 }
 0x567   :  { %v1237_v24 = vpop.f32.mrf.mxu1 }
 0x577   :  { %v1172_v12 = vpop.f32.mrf.mxu0 }
 0x578   :  { %v1240_v15 = vmax.f32 %v1141_v61, %v1172_v12  ;;  %v1254_v61 = vld [vmem:[%s2672_s10 + $0x30] sm:$0xff] }
 0x57e   :  { %v1203_v14 = vpop.f32.mrf.mxu3 }
 0x57f   :  { %v1242_v16 = vmax.f32 %v1203_v14, %v1234_v13  ;;  %v1175_v20 = vpop.f32.mrf.mxu0 }
 0x580   :  { %v1241_v22 = vmax.f32 %v1144_v11, %v1175_v20  ;;  %v1262_v11 = vld [vmem:[%s2672_s10 + $0x70] sm:$0xff] }
 0x581   :  { %v1244_v18 = vmax.f32 %v1240_v15, %v1242_v16 }
 0x583   :  { %v1246_v19 = vmax.f32 %v1244_v18, 0.0 }
 0x585   :  { %1285 = vrot.lane.b32.xlu2 %v1246_v19, %s1872_s19  ;;  %1281 = vrot.lane.b32.xlu0 %v1246_v19, %s1869_s1 }
 0x586   :  { %1724 = vmatmul.msk.f32.vlgmr.msrb.gmra.mxu0 %vm1293_vm2, %v1246_v19  ;;  %v1206_v21 = vpop.f32.mrf.mxu3 }
 0x587   :  { %v1243_v23 = vmax.f32 %v1206_v21, %v1237_v24 }
 0x589   :  { %v1245_v25 = vmax.f32 %v1241_v22, %v1243_v23 }
 0x58b   :  { %v1247_v7 = vmax.f32 %v1245_v25, 0.0 }
 0x58d   :  { %1291 = vrot.lane.b32.xlu2 %v1247_v7, %s1884_s5  ;;  %1287 = vrot.lane.b32.xlu0 %v1247_v7, %s1872_s19 }
 0x58e   :  { %1283 = vrot.lane.b32.xlu1 %v1247_v7, %s1869_s1  ;;  %1725 = vmatmul.msk.f32.gmra.mxu0 %vm1293_vm2, %v1247_v7 }
 0x595   :  { %1416 = vperm.xlu2 %1837, %v1275_v28   ;;  %1426 = vperm.xlu0 %1838, %v1277_v4  }
 0x596   :  { %1289 = vrot.lane.b32.xlu1 %v1246_v19, %s1884_s5 }
 0x59d   :  { %1406 = vperm.xlu2 %1837, %v1273_v29   ;;  %1401 = vperm.xlu0 %1838, %v1272_v0  }
 0x59e   :  { %1421 = vperm.xlu1 %1821, %v1276_v30  }
 0x5a5   :  { %1391 = vperm.xlu2 %1837, %v1270_v31   ;;  %1386 = vperm.xlu0 %1838, %v1269_v3  }
 0x5a6   :  { %1411 = vperm.xlu1 %1821, %v1274_v32  }
 0x5ad   :  { %1376 = vperm.xlu2 %1837, %v1267_v33   ;;  %1371 = vperm.xlu0 %1838, %v1266_v56  }
 0x5ae   :  { %1396 = vperm.xlu1 %1821, %v1271_v34  }
 0x5b5   :  { %1361 = vperm.xlu2 %1837, %v1264_v35   ;;  %1356 = vperm.xlu0 %1838, %v1263_v59  }
 0x5b6   :  { %1381 = vperm.xlu1 %1821, %v1268_v36  }
 0x5bd   :  { %1572 = vperm.xlu2 %1837, %v1558_v37   ;;  %1567 = vperm.xlu0 %1838, %v1557_v5  }
 0x5be   :  { %1366 = vperm.xlu1 %1821, %v1265_v38  }
 0x5c5   :  { %1632 = vperm.xlu2 %1837, %v1628_v39   ;;  %1637 = vperm.xlu0 %1838, %v1629_v6  }
 0x5c6   :  { %1577 = vperm.xlu1 %1821, %v1559_v40  }
 0x5ce   :  { %1562 = vperm.xlu1 %1821, %v1556_v41  }
 0x5df   :  { %v1286_v44 = vpop.permute.xlu2 %1285 }
 0x5e7   :  { %v1292_v48 = vpop.permute.xlu2 %1291 }
 0x5ef   :  { %v1417_v21 = vpop.permute.xlu2 %1416 }
 0x5f7   :  { %v1282_v42 = vpop.permute.xlu0 %1281  ;;  %v1407_v29 = vpop.permute.xlu2 %1406 }
 0x5f8   :  { %1726 = vmatmul.msk.f32.gmra.mxu0 %vm1293_vm2, %v1282_v42 }
 0x5ff   :  { %v1288_v27 = vpop.permute.xlu0 %1287  ;;  %v1392_v36 = vpop.permute.xlu2 %1391 }
 0x600   :  { %v1284_v43 = vpop.permute.xlu1 %1283 }
 0x601   :  { %1727 = vmatmul.msk.f32.gmra.mxu0 %vm1293_vm2, %v1284_v43 }
 0x603   :  { %v1330_v49 = vpop.f32.mrf.mxu0 }
 0x607   :  { %v1427_v22 = vpop.permute.xlu0 %1426 }
 0x608   :  { %v1290_v47 = vpop.permute.xlu1 %1289 }
 0x609   :  { %1728 = vmatmul.msk.f32.gmra.mxu0 %vm1293_vm2, %v1286_v44 }
 0x60b   :  { %v1333_v50 = vpop.f32.mrf.mxu0 }
 0x60f   :  { %v1402_v30 = vpop.permute.xlu0 %1401 }
 0x610   :  { %v1422_v24 = vpop.permute.xlu1 %1421 }
 0x611   :  { %1729 = vmatmul.msk.f32.gmra.mxu0 %vm1293_vm2, %v1288_v27 }
 0x617   :  { %v1387_v39 = vpop.permute.xlu0 %1386 }
 0x618   :  { %v1412_v7 = vpop.permute.xlu1 %1411 }
 0x619   :  { %1730 = vmatmul.msk.f32.gmra.mxu0 %vm1293_vm2, %v1290_v47 }
 0x620   :  { %v1397_v35 = vpop.permute.xlu1 %1396 }
 0x621   :  { %1731 = vmatmul.msk.f32.gmra.mxu0 %vm1293_vm2, %v1292_v48 }
 0x675   :  { %v1336_v46 = vpop.f32.mrf.mxu0 }
 0x67e   :  { %v1339_v17 = vpop.f32.mrf.mxu0 }
 0x686   :  { %v1342_v51 = vpop.f32.mrf.mxu0 }
 0x68e   :  { %v1345_v52 = vpop.f32.mrf.mxu0 }
 0x696   :  { %v1348_v1 = vpop.f32.mrf.mxu0 }
 0x69e   :  { %v1351_v53 = vpop.f32.mrf.mxu0 }
 0x69f   :  { %1483 = vmatpush.msrb.mxu1 %v1351_v53  ;;  %1753 = vmatpush.msrb.mxu3 %v1351_v53 }
 0x6a1   :  { %1484 = vmatpush.msrb.mxu1 %v1348_v1  ;;  %1754 = vmatpush.msrb.mxu3 %v1348_v1  ;;  %v1372_v1 = vpop.permute.xlu0 %1371 }
 0x6a3   :  { %1485 = vmatpush.msrb.mxu1 %v1345_v52  ;;  %1755 = vmatpush.msrb.mxu3 %v1345_v52  ;;  %v1377_v52 = vpop.permute.xlu2 %1376 }
 0x6a5   :  { %1486 = vmatpush.msrb.mxu1 %v1342_v51  ;;  %1756 = vmatpush.msrb.mxu3 %v1342_v51 }
 0x6a7   :  { %1487 = vmatpush.msrb.mxu1 %v1339_v17  ;;  %1757 = vmatpush.msrb.mxu3 %v1339_v17 }
 0x6a9   :  { %1488 = vmatpush.msrb.mxu1 %v1336_v46  ;;  %1758 = vmatpush.msrb.mxu3 %v1336_v46 }
 0x6ab   :  { %1489 = vmatpush.msrb.mxu1 %v1333_v50  ;;  %1759 = vmatpush.msrb.mxu3 %v1333_v50  ;;  %v1382_v50 = vpop.permute.xlu1 %1381 }
 0x6ad   :  { %1490 = vmatpush.msrb.mxu1 %v1330_v49  ;;  %1760 = vmatpush.msrb.mxu3 %v1330_v49 }
 0x6ae   :  { %1732 = vmatmul.msk.f32.vlgmr.msrb.gmra.mxu1 %vm1429_vm6, %v1248_v54  ;;  %1739 = vmatmul.msk.f32.vlgmr.msrb.gmra.mxu3 %vm1429_vm6, %v1255_v55 }
 0x6b6   :  { %1733 = vmatmul.msk.f32.gmra.mxu1 %vm1429_vm6, %v1249_v57  ;;  %1740 = vmatmul.msk.f32.gmra.mxu3 %vm1429_vm6, %v1256_v58  ;;  %v1367_v58 = vpop.permute.xlu1 %1366 }
 0x6be   :  { %1734 = vmatmul.msk.f32.gmra.mxu1 %vm1429_vm6, %v1250_v60  ;;  %1741 = vmatmul.msk.f32.gmra.mxu3 %vm1429_vm6, %v1257_v62  ;;  %v1362_v62 = vpop.permute.xlu2 %1361 }
 0x6c6   :  { %1735 = vmatmul.msk.f32.gmra.mxu1 %vm1429_vm6, %v1251_v63  ;;  %1742 = vmatmul.msk.f32.gmra.mxu3 %vm1429_vm6, %v1258_v2  ;;  %v1357_v63 = vpop.permute.xlu0 %1356 }
 0x6ce   :  { %1736 = vmatmul.msk.f32.gmra.mxu1 %vm1429_vm6, %v1252_v26  ;;  %1743 = vmatmul.msk.f32.gmra.mxu3 %vm1429_vm6, %v1259_v45 }
 0x6d6   :  { %1737 = vmatmul.msk.f32.gmra.mxu1 %vm1429_vm6, %v1253_v8  ;;  %1744 = vmatmul.msk.f32.gmra.mxu3 %vm1429_vm6, %v1260_v9  ;;  %v1552_v9 = vld [vmem:[%s2674_s12] sm:$0xff] }
 0x6de   :  { %1745 = vmatmul.msk.f32.gmra.mxu3 %vm1429_vm6, %v1261_v10  ;;  %1738 = vmatmul.msk.f32.gmra.mxu1 %vm1429_vm6, %v1254_v61  ;;  %v1553_v10 = vld [vmem:[%s2674_s12 + $0x8] sm:$0xff]  ;;  %v1554_v61 = vld [vmem:[%s2674_s12 + $0x10] sm:$0xff] }
 0x6e6   :  { %1746 = vmatmul.msk.f32.gmra.mxu3 %vm1429_vm6, %v1262_v11  ;;  %v1555_v11 = vld [vmem:[%s2674_s12 + $0x18] sm:$0xff] }
 0x72b   :  { %v2635_v14 = vpop.f32.mrf.mxu1 }
 0x72c   :  { %v1493_v45 = vadd.f32 %v2635_v14, %v1357_v63 }
 0x72e   :  { %v1537_v8 = vmax.f32 %v1493_v45, 0.0 }
 0x731   :  { %v1513_v12 = vpop.f32.mrf.mxu3 }
 0x732   :  { %v1514_v17 = vadd.f32 %v1513_v12, %v1392_v36 }
 0x733   :  { %v1495_v16 = vpop.f32.mrf.mxu1 }
 0x734   :  { %v1544_v0 = vmax.f32 %v1514_v17, 0.0  ;;  %v1496_v2 = vadd.f32 %v1495_v16, %v1362_v62  ;;  %v1573_v16 = vpop.permute.xlu2 %1572 }
 0x736   :  { %v1538_v6 = vmax.f32 %v1496_v2, 0.0 }
 0x739   :  { %v1516_v13 = vpop.f32.mrf.mxu3 }
 0x73a   :  { %v1517_v48 = vadd.f32 %v1516_v13, %v1397_v35 }
 0x73b   :  { %v1498_v19 = vpop.f32.mrf.mxu1 }
 0x73c   :  { %v1545_v4 = vmax.f32 %v1517_v48, 0.0  ;;  %v1499_v59 = vadd.f32 %v1498_v19, %v1367_v58 }
 0x73e   :  { %v1539_v26 = vmax.f32 %v1499_v59, 0.0 }
 0x741   :  { %v1519_v15 = vpop.f32.mrf.mxu3 }
 0x742   :  { %v1520_v27 = vadd.f32 %v1519_v15, %v1402_v30  ;;  %v1578_v15 = vpop.permute.xlu1 %1577  ;;  %v1626_v30 = vld [vmem:[%s2676_s14] sm:$0xff] }
 0x743   :  { %v1501_v23 = vpop.f32.mrf.mxu1 }
 0x744   :  { %v1546_v51 = vmax.f32 %v1520_v27, 0.0  ;;  %v1502_v56 = vadd.f32 %v1501_v23, %v1372_v1 }
 0x746   :  { %v1540_v5 = vmax.f32 %v1502_v56, 0.0 }
 0x749   :  { %v1522_v18 = vpop.f32.mrf.mxu3 }
 0x74a   :  { %v1523_v43 = vadd.f32 %v1522_v18, %v1407_v29  ;;  %v1563_v23 = vpop.permute.xlu1 %1562 }
 0x74b   :  { %v1504_v31 = vpop.f32.mrf.mxu1 }
 0x74c   :  { %v1547_v49 = vmax.f32 %v1523_v43, 0.0  ;;  %v1505_v54 = vadd.f32 %v1504_v31, %v1377_v52  ;;  %v1627_v31 = vld [vmem:[%s2676_s14 + $0x8] sm:$0x3] }
 0x74e   :  { %v1541_v60 = vmax.f32 %v1505_v54, 0.0 }
 0x751   :  { %v1525_v20 = vpop.f32.mrf.mxu3 }
 0x752   :  { %v1526_v41 = vadd.f32 %v1525_v20, %v1412_v7 }
 0x753   :  { %v1507_v40 = vpop.f32.mrf.mxu1 }
 0x754   :  { %v1548_v47 = vmax.f32 %v1526_v41, 0.0  ;;  %v1508_v3 = vadd.f32 %v1507_v40, %v1382_v50 }
 0x756   :  { %v1542_v57 = vmax.f32 %v1508_v3, 0.0 }
 0x759   :  { %v1528_v25 = vpop.f32.mrf.mxu3 }
 0x75a   :  { %v1529_v37 = vadd.f32 %v1528_v25, %v1417_v21 }
 0x75b   :  { %v1510_v46 = vpop.f32.mrf.mxu1 }
 0x75c   :  { %v1549_v44 = vmax.f32 %v1529_v37, 0.0  ;;  %v1511_v53 = vadd.f32 %v1510_v46, %v1387_v39 }
 0x75e   :  { %v1543_v55 = vmax.f32 %v1511_v53, 0.0 }
 0x761   :  { %v1531_v28 = vpop.f32.mrf.mxu3 }
 0x762   :  { %v1532_v33 = vadd.f32 %v1531_v28, %v1422_v24  ;;  %v1568_v24 = vpop.permute.xlu0 %1567 }
 0x764   :  { %v1550_v42 = vmax.f32 %v1532_v33, 0.0 }
 0x769   :  { %v1534_v32 = vpop.f32.mrf.mxu3 }
 0x76a   :  { %v1535_v34 = vadd.f32 %v1534_v32, %v1427_v22  ;;  %v1633_v32 = vpop.permute.xlu2 %1632  ;;  %v1638_v35 = vpop.permute.xlu0 %1637 }
 0x76c   :  { %v1551_v38 = vmax.f32 %v1535_v34, 0.0 }
 0x76e   :  { %1594 = vmatpush.msrb.mxu2 %v1551_v38 }
 0x770   :  { %1595 = vmatpush.msrb.mxu2 %v1550_v42 }
 0x772   :  { %1596 = vmatpush.msrb.mxu2 %v1549_v44 }
 0x774   :  { %1597 = vmatpush.msrb.mxu2 %v1548_v47 }
 0x776   :  { %1598 = vmatpush.msrb.mxu2 %v1547_v49 }
 0x778   :  { %1599 = vmatpush.msrb.mxu2 %v1546_v51 }
 0x77a   :  { %1600 = vmatpush.msrb.mxu2 %v1545_v4 }
 0x77c   :  { %1601 = vmatpush.msrb.mxu2 %v1544_v0 }
 0x77e   :  { %1602 = vmatpush.msrb.mxu2 %v1543_v55 }
 0x780   :  { %1603 = vmatpush.msrb.mxu2 %v1542_v57 }
 0x782   :  { %1604 = vmatpush.msrb.mxu2 %v1541_v60 }
 0x784   :  { %1605 = vmatpush.msrb.mxu2 %v1540_v5 }
 0x786   :  { %1606 = vmatpush.msrb.mxu2 %v1539_v26 }
 0x788   :  { %1607 = vmatpush.msrb.mxu2 %v1538_v6 }
 0x78a   :  { %1608 = vmatpush.msrb.mxu2 %v1537_v8 }
 0x78b   :  { %1747 = vmatmul.msk.f32.vlgmr.msrb.gmra.mxu2 %vm1580_vm9, %v1552_v9 }
 0x793   :  { %1748 = vmatmul.msk.f32.gmra.mxu2 %vm1580_vm9, %v1553_v10 }
 0x79b   :  { %1749 = vmatmul.msk.f32.gmra.mxu2 %vm1580_vm9, %v1554_v61 }
 0x7a3   :  { %1750 = vmatmul.msk.f32.gmra.mxu2 %vm1580_vm9, %v1555_v11 }
 0x80e   :  { %v1610_v12 = vpop.f32.mrf.mxu2 }
 0x80f   :  { %v1611_v25 = vadd.f32 %v1610_v12, %v1563_v23 }
 0x811   :  { %v1622_v29 = vmax.f32 %v1611_v25, 0.0 }
 0x816   :  { %v1613_v13 = vpop.f32.mrf.mxu2 }
 0x817   :  { %v1614_v21 = vadd.f32 %v1613_v13, %v1568_v24 }
 0x819   :  { %v1623_v28 = vmax.f32 %v1614_v21, 0.0 }
 0x81e   :  { %v1616_v14 = vpop.f32.mrf.mxu2 }
 0x81f   :  { %v1617_v19 = vadd.f32 %v1616_v14, %v1573_v16 }
 0x821   :  { %v1624_v7 = vmax.f32 %v1617_v19, 0.0 }
 0x826   :  { %v1619_v18 = vpop.f32.mrf.mxu2 }
 0x827   :  { %v1620_v20 = vadd.f32 %v1619_v18, %v1578_v15 }
 0x829   :  { %v1625_v22 = vmax.f32 %v1620_v20, 0.0 }
 0x82b   :  { %1659 = vmatpush.msra.mxu1 %v1625_v22 }
 0x82d   :  { %1660 = vmatpush.msra.mxu1 %v1624_v7 }
 0x82f   :  { %1661 = vmatpush.msra.mxu1 %v1623_v28 }
 0x831   :  { %1662 = vmatpush.msra.mxu1 %v1622_v29 }
 0x832   :  { %1751 = vmatmul.msk.f32.vlgmr.msra.gmra.mxu1 %vm1640_vm10, %v1626_v30 }
 0x83a   :  { %1752 = vmatmul.msk.f32.gmra.mxu1 %vm1640_vm10, %v1627_v31 }
 0x8af   :  { %v1664_v33 = vpop.f32.mrf.mxu1 }
 0x8b0   :  { %v1665_v34 = vadd.f32 %v1664_v33, %v1633_v32 }
 0x8b2   :  { %1671 = vst.msk [vmem:[%s2678_s16] sm:$0xff] %vm1670_vm11, %v1665_v34 }
 0x8b7   :  { %v1667_v36 = vpop.f32.mrf.mxu1 }
 0x8b8   :  { %v1668_v37 = vadd.f32 %v1667_v36, %v1638_v35 }
 0x8ba   :  { %1673 = vst.msk [vmem:[%s2678_s16 + $0x8] sm:$0x3] %vm1672_vm12, %v1668_v37 }
 0x8bb   :  { %1678 = vsyncpa [#allocation3], 1 }

</bundles_post_ra>
